<compile_context>
chip_gen: v7x
topology: tpu7x:2x2x1
jax: 0.10.0
libtpu: 0.0.40
codegen_flags: <defaults>
</compile_context>

<pallas_src>
import jax
import jax.numpy as jnp
from jax.experimental import pallas as pl
from jax.experimental.pallas import tpu as pltpu

# --- model hyper-params (small, consistent with the module defaults) ---------
INPUT_DIM  = 1
SEQ_LEN    = 8
PRED_LEN   = 4
HIDDEN_DIM = 32
NUM_LAYERS = 3                               # -> NUM_LAYERS - 1 = 2 FAN layers
NUM_FAN_LAYERS = NUM_LAYERS - 1
P_DIM = int(HIDDEN_DIM * 0.25)               # FANLayerGated p_ratio = 0.25 -> 8
G_DIM = HIDDEN_DIM - 2 * P_DIM               # 16


def _gelu_exact(x):
    # matches torch.nn.functional.gelu default (erf form)
    return 0.5 * x * (1.0 + jax.lax.erf(x * (1.0 / jnp.sqrt(2.0))))


# -------------------------- fused Pallas kernel -------------------------------
def _fan_forecaster_kernel(x_ref, embpos_ref, fanw_ref, gates_ref,
                           wproj_ref, wo_ref, out_ref, h_ref, hflat_ref):
    """Fused forward pass.

    x_ref:      (B*S, 1)        raw series values (input_dim == 1)
    embpos_ref: (S+2, H)        rows 0..S-1: pos + b_emb, row S: w_emb, row S+1: b_proj
    fanw_ref:   (L, H+1, P+G)   per layer: rows 0..H-1 = [wp | wg], row H = [bp | bg]
    gates_ref:  (1, L)   SMEM   raw gate scalars
    wproj_ref:  (S*H, H)        seq_projection weight
    wo_ref:     (H+1, PRED)     rows 0..H-1 = w_out, row H = b_out
    out_ref:    (B, PRED)
    h_ref:      (B*S, H)  VMEM scratch (FAN-stack hidden state)
    hflat_ref:  (B, S*H)  VMEM scratch (torch's x.view(B, -1))
    """
    n_rows = x_ref.shape[0]
    batch = n_rows // SEQ_LEN

    pos   = embpos_ref[0:SEQ_LEN, :]                        # (S, H), b_emb folded in
    w_emb = embpos_ref[SEQ_LEN:SEQ_LEN + 1, :]              # (1, H)

    # ---- embedding: input_dim == 1 => outer product on the VPU, no MXU ------
    for b in range(batch):
        r0 = b * SEQ_LEN
        h_ref[r0:r0 + SEQ_LEN, :] = x_ref[r0:r0 + SEQ_LEN, :] * w_emb + pos

    # ---- FAN gated layers: one fused (H x (P+G)) matmul per layer -----------
    for l in range(NUM_FAN_LAYERS):
        h = h_ref[...]                                      # (B*S, H)
        layer_slab = fanw_ref[l]                            # (H+1, P+G)
        w_cat = layer_slab[0:HIDDEN_DIM, :]                 # (H, P+G) = [wp | wg]
        b_cat = layer_slab[HIDDEN_DIM:HIDDEN_DIM + 1, :]    # (1, P+G) = [bp | bg]
        y = jnp.dot(h, w_cat, preferred_element_type=jnp.float32) + b_cat
        p = y[:, 0:P_DIM]
        g = _gelu_exact(y[:, P_DIM:])
        gate = jax.nn.sigmoid(gates_ref[0, l])
        # static lane-slice stores instead of a sub-128-lane concatenate
        h_ref[:, 0:P_DIM]         = gate * jnp.cos(p)
        h_ref[:, P_DIM:2 * P_DIM] = gate * jnp.sin(p)
        h_ref[:, 2 * P_DIM:]      = (1.0 - gate) * g

    # ---- head: rebuild torch's x.view(B, S*H) with static slice copies ------
    for b in range(batch):
        for s in range(SEQ_LEN):
            r = b * SEQ_LEN + s
            hflat_ref[b:b + 1, s * HIDDEN_DIM:(s + 1) * HIDDEN_DIM] = h_ref[r:r + 1, :]

    b_proj = embpos_ref[SEQ_LEN + 1:SEQ_LEN + 2, :]         # (1, H)
    z = jnp.dot(hflat_ref[...], wproj_ref[...], preferred_element_type=jnp.float32)
    z = jnp.maximum(z + b_proj, 0.0)

    w_out = wo_ref[0:HIDDEN_DIM, :]                         # (H, PRED)
    b_out = wo_ref[HIDDEN_DIM:HIDDEN_DIM + 1, :]            # (1, PRED)
    out_ref[...] = jnp.dot(z, w_out, preferred_element_type=jnp.float32) + b_out


# -------------------------- parameters ----------------------------------------
def init_params(key):
    ks = jax.random.split(key, 7 + 5 * NUM_FAN_LAYERS)

    def lin(k, shape, scale=0.05):
        return (scale * jax.random.normal(k, shape)).astype(jnp.float32)

    params = dict(
        w_emb=lin(ks[0], (INPUT_DIM, HIDDEN_DIM)),            # Linear weight^T
        b_emb=lin(ks[1], (1, HIDDEN_DIM)),
        pos=lin(ks[2], (SEQ_LEN, HIDDEN_DIM)),                # positional encoding
        w_proj=lin(ks[3], (SEQ_LEN * HIDDEN_DIM, HIDDEN_DIM)),
        b_proj=lin(ks[4], (1, HIDDEN_DIM)),
        w_out=lin(ks[5], (HIDDEN_DIM, PRED_LEN)),
        b_out=lin(ks[6], (1, PRED_LEN)),
        layers=[],
    )
    for i in range(NUM_FAN_LAYERS):
        b = 7 + 5 * i
        params["layers"].append(dict(
            wp=lin(ks[b + 0], (HIDDEN_DIM, P_DIM)),
            bp=lin(ks[b + 1], (1, P_DIM)),
            wg=lin(ks[b + 2], (HIDDEN_DIM, G_DIM)),
            bg=lin(ks[b + 3], (1, G_DIM)),
            gate=lin(ks[b + 4], (1, 1), scale=1.0),           # torch.randn(1)
        ))
    return params


def pack_params(params):
    """One-time host-side packing into a few lane-friendly slabs.

    Folds b_emb into the positional table and fuses [wp|wg] / [bp|bg] per FAN
    layer so the kernel does one matmul per layer and the wrapper emits zero
    per-call pad/tile/reshape HLOs for the parameters.
    """
    assert INPUT_DIM == 1  # the kernel exploits the degenerate K=1 embedding
    embpos = jnp.concatenate(
        [params["pos"] + params["b_emb"],                     # rows 0..S-1
         params["w_emb"].reshape(1, HIDDEN_DIM),              # row S
         params["b_proj"]],                                   # row S+1
        axis=0)                                               # (S+2, H)
    fanw = jnp.stack(
        [jnp.concatenate(
            [jnp.concatenate([l["wp"], l["wg"]], axis=1),     # (H, P+G)
             jnp.concatenate([l["bp"], l["bg"]], axis=1)],    # (1, P+G)
            axis=0)
         for l in params["layers"]], axis=0)                  # (L, H+1, P+G)
    gates = jnp.concatenate([l["gate"] for l in params["layers"]], axis=1)  # (1, L)
    wo = jnp.concatenate([params["w_out"], params["b_out"]], axis=0)        # (H+1, PRED)
    return dict(embpos=embpos, fanw=fanw, gates=gates,
                wproj=params["w_proj"], wo=wo)


# -------------------------- wrapper (glue) ------------------------------------
@jax.jit
def fan_gated_forecaster(packed, x):
    B = x.shape[0]
    need = SEQ_LEN * INPUT_DIM
    # reproduce the torch module's truncate / zero-pad behaviour, but only emit
    # the extra HLOs when the (static) shape actually mismatches
    if x.shape[1] > need:
        x = x[:, :need]
    elif x.shape[1] < need:
        x = jnp.pad(x, ((0, 0), (0, need - x.shape[1])))
    x_col = x.reshape(B * SEQ_LEN, INPUT_DIM).astype(jnp.float32)

    vmem = pl.BlockSpec(memory_space=pltpu.MemorySpace.VMEM)
    smem = pl.BlockSpec(memory_space=pltpu.MemorySpace.SMEM)

    # NOTE: at large batch, add a ("parallel",) grid over row-blocks (multiples
    # of 8 rows) for v7x's dual TensorCores and a lane-dense padded output for
    # v5e; at B=2 a single gridless invocation is optimal.
    return pl.pallas_call(
        _fan_forecaster_kernel,
        out_shape=jax.ShapeDtypeStruct((B, PRED_LEN), jnp.float32),
        in_specs=[vmem, vmem, vmem, smem, vmem, vmem],
        out_specs=vmem,
        scratch_shapes=[
            pltpu.VMEM((B * SEQ_LEN, HIDDEN_DIM), jnp.float32),
            pltpu.VMEM((B, SEQ_LEN * HIDDEN_DIM), jnp.float32),
        ],
    )(x_col, packed["embpos"], packed["fanw"], packed["gates"],
      packed["wproj"], packed["wo"])


# -------------------------- pure-JAX reference --------------------------------
def reference(params, x):
    B = x.shape[0]
    xt = x.reshape(B, SEQ_LEN, INPUT_DIM).astype(jnp.float32)
    h = xt @ params["w_emb"] + params["b_emb"] + params["pos"][None]
    for l in params["layers"]:
        g = _gelu_exact(h @ l["wg"] + l["bg"])
        p = h @ l["wp"] + l["bp"]
        gate = jax.nn.sigmoid(l["gate"][0, 0])
        h = jnp.concatenate(
            [gate * jnp.cos(p), gate * jnp.sin(p), (1.0 - gate) * g], axis=-1)
    hf = h.reshape(B, -1)
    z = jnp.maximum(hf @ params["w_proj"] + params["b_proj"], 0.0)
    return z @ params["w_out"] + params["b_out"]


if __name__ == "__main__":
    key = jax.random.PRNGKey(0)
    pkey, xkey = jax.random.split(key)
    params = init_params(pkey)
    packed = pack_params(params)

    B = 2
    x = jax.random.normal(xkey, (B, SEQ_LEN * INPUT_DIM), dtype=jnp.float32)

    out = fan_gated_forecaster(packed, x)
    out = jax.block_until_ready(out)

    ref = reference(params, x)
    assert out.shape == (B, PRED_LEN)
    assert jnp.allclose(out, ref, atol=1e-4, rtol=1e-4), "mismatch vs reference"
    print("KERNEL_OK")
</pallas_src>

<mosaic_0001>
module attributes {stable_mosaic.version = 11 : i64} {
  func.func @_fan_forecaster_kernel(%arg0: memref<16x1xf32, #tpu.memory_space<vmem>>, %arg1: memref<10x32xf32, #tpu.memory_space<vmem>>, %arg2: memref<2x33x24xf32, #tpu.memory_space<vmem>>, %arg3: memref<1x2xf32, #tpu.memory_space<smem>>, %arg4: memref<256x32xf32, #tpu.memory_space<vmem>>, %arg5: memref<33x4xf32, #tpu.memory_space<vmem>>, %arg6: memref<2x4xf32, #tpu.memory_space<vmem>>, %arg7: memref<16x32xf32, #tpu.memory_space<vmem>>, %arg8: memref<2x256xf32, #tpu.memory_space<vmem>>) attributes {dimension_semantics = [], scalar_prefetch = 0 : i64, scratch_operands = 2 : i64, tpu.core_type = #tpu.core_type<tc>} {
    %c0 = arith.constant 0 : index
    %c0_0 = arith.constant 0 : index
    %0 = vector.load %arg1[%c0, %c0_0] : memref<10x32xf32, #tpu.memory_space<vmem>>, vector<8x32xf32>
    %c8 = arith.constant 8 : index
    %c0_1 = arith.constant 0 : index
    %1 = vector.load %arg1[%c8, %c0_1] : memref<10x32xf32, #tpu.memory_space<vmem>>, vector<1x32xf32>
    %c0_2 = arith.constant 0 : index
    %c0_3 = arith.constant 0 : index
    %2 = vector.load %arg0[%c0_2, %c0_3] : memref<16x1xf32, #tpu.memory_space<vmem>>, vector<8x1xf32>
    %3 = vector.broadcast %2 : vector<8x1xf32> to vector<8x32xf32>
    %4 = vector.broadcast %1 : vector<1x32xf32> to vector<8x32xf32>
    %5 = arith.mulf %3, %4 : vector<8x32xf32>
    %6 = arith.addf %5, %0 : vector<8x32xf32>
    %c0_4 = arith.constant 0 : index
    %c0_5 = arith.constant 0 : index
    %7 = vector.load %arg7[%c0_4, %c0_5] : memref<16x32xf32, #tpu.memory_space<vmem>>, vector<8x32xf32>
    tpu.vector_store %arg7[%c0_4, %c0_5], %6 {strides = array<i32>} : memref<16x32xf32, #tpu.memory_space<vmem>>, vector<8x32xf32>,
    %c8_6 = arith.constant 8 : index
    %c0_7 = arith.constant 0 : index
    %8 = vector.load %arg0[%c8_6, %c0_7] : memref<16x1xf32, #tpu.memory_space<vmem>>, vector<8x1xf32>
    %9 = vector.broadcast %8 : vector<8x1xf32> to vector<8x32xf32>
    %10 = vector.broadcast %1 : vector<1x32xf32> to vector<8x32xf32>
    %11 = arith.mulf %9, %10 : vector<8x32xf32>
    %12 = arith.addf %11, %0 : vector<8x32xf32>
    %c8_8 = arith.constant 8 : index
    %c0_9 = arith.constant 0 : index
    %13 = vector.load %arg7[%c8_8, %c0_9] : memref<16x32xf32, #tpu.memory_space<vmem>>, vector<8x32xf32>
    tpu.vector_store %arg7[%c8_8, %c0_9], %12 {strides = array<i32>} : memref<16x32xf32, #tpu.memory_space<vmem>>, vector<8x32xf32>,
    %c0_10 = arith.constant 0 : index
    %c0_11 = arith.constant 0 : index
    %14 = vector.load %arg7[%c0_10, %c0_11] : memref<16x32xf32, #tpu.memory_space<vmem>>, vector<16x32xf32>
    %c0_12 = arith.constant 0 : index
    %c0_13 = arith.constant 0 : index
    %c0_14 = arith.constant 0 : index
    %15 = vector.load %arg2[%c0_12, %c0_13, %c0_14] : memref<2x33x24xf32, #tpu.memory_space<vmem>>, vector<1x33x24xf32>
    %16 = vector.shape_cast %15 : vector<1x33x24xf32> to vector<33x24xf32>
    %17 = vector.extract_strided_slice %16 {offsets = [0, 0], sizes = [32, 24], strides = [1, 1]} : vector<33x24xf32> to vector<32x24xf32>
    %18 = vector.extract_strided_slice %16 {offsets = [32, 0], sizes = [1, 24], strides = [1, 1]} : vector<33x24xf32> to vector<1x24xf32>
    %cst = arith.constant dense<0.000000e+00> : vector<16x24xf32>
    %19 = tpu.matmul %14, %17, %cst {dimension_numbers = #tpu.dot_dimension_numbers<[1], [0], [0], [1], [0, 0, 1, 1], [], []>} : vector<16x32xf32>, vector<32x24xf32>, vector<16x24xf32> -> vector<16x24xf32>
    %20 = vector.broadcast %18 : vector<1x24xf32> to vector<16x24xf32>
    %21 = arith.addf %19, %20 : vector<16x24xf32>
    %22 = vector.extract_strided_slice %21 {offsets = [0, 0], sizes = [16, 8], strides = [1, 1]} : vector<16x24xf32> to vector<16x8xf32>
    %23 = vector.extract_strided_slice %21 {offsets = [0, 8], sizes = [16, 16], strides = [1, 1]} : vector<16x24xf32> to vector<16x16xf32>
    %cst_15 = arith.constant 5.000000e-01 : f32
    %24 = vector.broadcast %cst_15 : f32 to vector<16x16xf32>
    %25 = arith.mulf %24, %23 : vector<16x16xf32>
    %cst_16 = arith.constant 2.000000e+00 : f32
    %26 = math.sqrt %cst_16 : f32
    %cst_17 = arith.constant 1.000000e+00 : f32
    %27 = arith.divf %cst_17, %26 : f32
    %28 = vector.broadcast %27 : f32 to vector<16x16xf32>
    %29 = arith.mulf %23, %28 : vector<16x16xf32>
    %30 = math.erf %29 : vector<16x16xf32>
    %cst_18 = arith.constant 1.000000e+00 : f32
    %31 = vector.broadcast %cst_18 : f32 to vector<16x16xf32>
    %32 = arith.addf %31, %30 : vector<16x16xf32>
    %33 = arith.mulf %25, %32 : vector<16x16xf32>
    %c0_19 = arith.constant 0 : index
    %c0_20 = arith.constant 0 : index
    %34 = memref.load %arg3[%c0_19, %c0_20] : memref<1x2xf32, #tpu.memory_space<smem>>
    %35 = arith.negf %34 : f32
    %36 = math.exp %35 : f32
    %cst_21 = arith.constant 1.000000e+00 : f32
    %37 = arith.addf %cst_21, %36 : f32
    %38 = arith.divf %cst_21, %37 : f32
    %39 = math.cos %22 : vector<16x8xf32>
    %40 = vector.broadcast %38 : f32 to vector<16x8xf32>
    %41 = arith.mulf %40, %39 : vector<16x8xf32>
    %c0_22 = arith.constant 0 : index
    %c0_23 = arith.constant 0 : index
    %42 = vector.load %arg7[%c0_22, %c0_23] : memref<16x32xf32, #tpu.memory_space<vmem>>, vector<16x8xf32>
    tpu.vector_store %arg7[%c0_22, %c0_23], %41 {strides = array<i32>} : memref<16x32xf32, #tpu.memory_space<vmem>>, vector<16x8xf32>,
    %43 = math.sin %22 : vector<16x8xf32>
    %44 = vector.broadcast %38 : f32 to vector<16x8xf32>
    %45 = arith.mulf %44, %43 : vector<16x8xf32>
    %c0_24 = arith.constant 0 : index
    %c8_25 = arith.constant 8 : index
    %46 = vector.load %arg7[%c0_24, %c8_25] : memref<16x32xf32, #tpu.memory_space<vmem>>, vector<16x8xf32>
    tpu.vector_store %arg7[%c0_24, %c8_25], %45 {strides = array<i32>} : memref<16x32xf32, #tpu.memory_space<vmem>>, vector<16x8xf32>,
    %cst_26 = arith.constant 1.000000e+00 : f32
    %47 = arith.subf %cst_26, %38 : f32
    %48 = vector.broadcast %47 : f32 to vector<16x16xf32>
    %49 = arith.mulf %48, %33 : vector<16x16xf32>
    %c0_27 = arith.constant 0 : index
    %c16 = arith.constant 16 : index
    %50 = vector.load %arg7[%c0_27, %c16] : memref<16x32xf32, #tpu.memory_space<vmem>>, vector<16x16xf32>
    tpu.vector_store %arg7[%c0_27, %c16], %49 {strides = array<i32>} : memref<16x32xf32, #tpu.memory_space<vmem>>, vector<16x16xf32>,
    %c0_28 = arith.constant 0 : index
    %c0_29 = arith.constant 0 : index
    %51 = vector.load %arg7[%c0_28, %c0_29] : memref<16x32xf32, #tpu.memory_space<vmem>>, vector<16x32xf32>
    %c1 = arith.constant 1 : index
    %c0_30 = arith.constant 0 : index
    %c0_31 = arith.constant 0 : index
    %52 = vector.load %arg2[%c1, %c0_30, %c0_31] : memref<2x33x24xf32, #tpu.memory_space<vmem>>, vector<1x33x24xf32>
    %53 = vector.shape_cast %52 : vector<1x33x24xf32> to vector<33x24xf32>
    %54 = vector.extract_strided_slice %53 {offsets = [0, 0], sizes = [32, 24], strides = [1, 1]} : vector<33x24xf32> to vector<32x24xf32>
    %55 = vector.extract_strided_slice %53 {offsets = [32, 0], sizes = [1, 24], strides = [1, 1]} : vector<33x24xf32> to vector<1x24xf32>
    %cst_32 = arith.constant dense<0.000000e+00> : vector<16x24xf32>
    %56 = tpu.matmul %51, %54, %cst_32 {dimension_numbers = #tpu.dot_dimension_numbers<[1], [0], [0], [1], [0, 0, 1, 1], [], []>} : vector<16x32xf32>, vector<32x24xf32>, vector<16x24xf32> -> vector<16x24xf32>
    %57 = vector.broadcast %55 : vector<1x24xf32> to vector<16x24xf32>
    %58 = arith.addf %56, %57 : vector<16x24xf32>
    %59 = vector.extract_strided_slice %58 {offsets = [0, 0], sizes = [16, 8], strides = [1, 1]} : vector<16x24xf32> to vector<16x8xf32>
    %60 = vector.extract_strided_slice %58 {offsets = [0, 8], sizes = [16, 16], strides = [1, 1]} : vector<16x24xf32> to vector<16x16xf32>
    %cst_33 = arith.constant 5.000000e-01 : f32
    %61 = vector.broadcast %cst_33 : f32 to vector<16x16xf32>
    %62 = arith.mulf %61, %60 : vector<16x16xf32>
    %cst_34 = arith.constant 2.000000e+00 : f32
    %63 = math.sqrt %cst_34 : f32
    %cst_35 = arith.constant 1.000000e+00 : f32
    %64 = arith.divf %cst_35, %63 : f32
    %65 = vector.broadcast %64 : f32 to vector<16x16xf32>
    %66 = arith.mulf %60, %65 : vector<16x16xf32>
    %67 = math.erf %66 : vector<16x16xf32>
    %cst_36 = arith.constant 1.000000e+00 : f32
    %68 = vector.broadcast %cst_36 : f32 to vector<16x16xf32>
    %69 = arith.addf %68, %67 : vector<16x16xf32>
    %70 = arith.mulf %62, %69 : vector<16x16xf32>
    %c0_37 = arith.constant 0 : index
    %c1_38 = arith.constant 1 : index
    %71 = memref.load %arg3[%c0_37, %c1_38] : memref<1x2xf32, #tpu.memory_space<smem>>
    %72 = arith.negf %71 : f32
    %73 = math.exp %72 : f32
    %cst_39 = arith.constant 1.000000e+00 : f32
    %74 = arith.addf %cst_39, %73 : f32
    %75 = arith.divf %cst_39, %74 : f32
    %76 = math.cos %59 : vector<16x8xf32>
    %77 = vector.broadcast %75 : f32 to vector<16x8xf32>
    %78 = arith.mulf %77, %76 : vector<16x8xf32>
    %c0_40 = arith.constant 0 : index
    %c0_41 = arith.constant 0 : index
    %79 = vector.load %arg7[%c0_40, %c0_41] : memref<16x32xf32, #tpu.memory_space<vmem>>, vector<16x8xf32>
    tpu.vector_store %arg7[%c0_40, %c0_41], %78 {strides = array<i32>} : memref<16x32xf32, #tpu.memory_space<vmem>>, vector<16x8xf32>,
    %80 = math.sin %59 : vector<16x8xf32>
    %81 = vector.broadcast %75 : f32 to vector<16x8xf32>
    %82 = arith.mulf %81, %80 : vector<16x8xf32>
    %c0_42 = arith.constant 0 : index
    %c8_43 = arith.constant 8 : index
    %83 = vector.load %arg7[%c0_42, %c8_43] : memref<16x32xf32, #tpu.memory_space<vmem>>, vector<16x8xf32>
    tpu.vector_store %arg7[%c0_42, %c8_43], %82 {strides = array<i32>} : memref<16x32xf32, #tpu.memory_space<vmem>>, vector<16x8xf32>,
    %cst_44 = arith.constant 1.000000e+00 : f32
    %84 = arith.subf %cst_44, %75 : f32
    %85 = vector.broadcast %84 : f32 to vector<16x16xf32>
    %86 = arith.mulf %85, %70 : vector<16x16xf32>
    %c0_45 = arith.constant 0 : index
    %c16_46 = arith.constant 16 : index
    %87 = vector.load %arg7[%c0_45, %c16_46] : memref<16x32xf32, #tpu.memory_space<vmem>>, vector<16x16xf32>
    tpu.vector_store %arg7[%c0_45, %c16_46], %86 {strides = array<i32>} : memref<16x32xf32, #tpu.memory_space<vmem>>, vector<16x16xf32>,
    %c0_47 = arith.constant 0 : index
    %c0_48 = arith.constant 0 : index
    %88 = vector.load %arg7[%c0_47, %c0_48] : memref<16x32xf32, #tpu.memory_space<vmem>>, vector<1x32xf32>
    %c0_49 = arith.constant 0 : index
    %c0_50 = arith.constant 0 : index
    %89 = vector.load %arg8[%c0_49, %c0_50] : memref<2x256xf32, #tpu.memory_space<vmem>>, vector<1x32xf32>
    tpu.vector_store %arg8[%c0_49, %c0_50], %88 {strides = array<i32>} : memref<2x256xf32, #tpu.memory_space<vmem>>, vector<1x32xf32>,
    %c1_51 = arith.constant 1 : index
    %c0_52 = arith.constant 0 : index
    %90 = vector.load %arg7[%c1_51, %c0_52] : memref<16x32xf32, #tpu.memory_space<vmem>>, vector<1x32xf32>
    %c0_53 = arith.constant 0 : index
    %c32 = arith.constant 32 : index
    %91 = vector.load %arg8[%c0_53, %c32] : memref<2x256xf32, #tpu.memory_space<vmem>>, vector<1x32xf32>
    tpu.vector_store %arg8[%c0_53, %c32], %90 {strides = array<i32>} : memref<2x256xf32, #tpu.memory_space<vmem>>, vector<1x32xf32>,
    %c2 = arith.constant 2 : index
    %c0_54 = arith.constant 0 : index
    %92 = vector.load %arg7[%c2, %c0_54] : memref<16x32xf32, #tpu.memory_space<vmem>>, vector<1x32xf32>
    %c0_55 = arith.constant 0 : index
    %c64 = arith.constant 64 : index
    %93 = vector.load %arg8[%c0_55, %c64] : memref<2x256xf32, #tpu.memory_space<vmem>>, vector<1x32xf32>
    tpu.vector_store %arg8[%c0_55, %c64], %92 {strides = array<i32>} : memref<2x256xf32, #tpu.memory_space<vmem>>, vector<1x32xf32>,
    %c3 = arith.constant 3 : index
    %c0_56 = arith.constant 0 : index
    %94 = vector.load %arg7[%c3, %c0_56] : memref<16x32xf32, #tpu.memory_space<vmem>>, vector<1x32xf32>
    %c0_57 = arith.constant 0 : index
    %c96 = arith.constant 96 : index
    %95 = vector.load %arg8[%c0_57, %c96] : memref<2x256xf32, #tpu.memory_space<vmem>>, vector<1x32xf32>
    tpu.vector_store %arg8[%c0_57, %c96], %94 {strides = array<i32>} : memref<2x256xf32, #tpu.memory_space<vmem>>, vector<1x32xf32>,
    %c4 = arith.constant 4 : index
    %c0_58 = arith.constant 0 : index
    %96 = vector.load %arg7[%c4, %c0_58] : memref<16x32xf32, #tpu.memory_space<vmem>>, vector<1x32xf32>
    %c0_59 = arith.constant 0 : index
    %c128 = arith.constant 128 : index
    %97 = vector.load %arg8[%c0_59, %c128] : memref<2x256xf32, #tpu.memory_space<vmem>>, vector<1x32xf32>
    tpu.vector_store %arg8[%c0_59, %c128], %96 {strides = array<i32>} : memref<2x256xf32, #tpu.memory_space<vmem>>, vector<1x32xf32>,
    %c5 = arith.constant 5 : index
    %c0_60 = arith.constant 0 : index
    %98 = vector.load %arg7[%c5, %c0_60] : memref<16x32xf32, #tpu.memory_space<vmem>>, vector<1x32xf32>
    %c0_61 = arith.constant 0 : index
    %c160 = arith.constant 160 : index
    %99 = vector.load %arg8[%c0_61, %c160] : memref<2x256xf32, #tpu.memory_space<vmem>>, vector<1x32xf32>
    tpu.vector_store %arg8[%c0_61, %c160], %98 {strides = array<i32>} : memref<2x256xf32, #tpu.memory_space<vmem>>, vector<1x32xf32>,
    %c6 = arith.constant 6 : index
    %c0_62 = arith.constant 0 : index
    %100 = vector.load %arg7[%c6, %c0_62] : memref<16x32xf32, #tpu.memory_space<vmem>>, vector<1x32xf32>
    %c0_63 = arith.constant 0 : index
    %c192 = arith.constant 192 : index
    %101 = vector.load %arg8[%c0_63, %c192] : memref<2x256xf32, #tpu.memory_space<vmem>>, vector<1x32xf32>
    tpu.vector_store %arg8[%c0_63, %c192], %100 {strides = array<i32>} : memref<2x256xf32, #tpu.memory_space<vmem>>, vector<1x32xf32>,
    %c7 = arith.constant 7 : index
    %c0_64 = arith.constant 0 : index
    %102 = vector.load %arg7[%c7, %c0_64] : memref<16x32xf32, #tpu.memory_space<vmem>>, vector<1x32xf32>
    %c0_65 = arith.constant 0 : index
    %c224 = arith.constant 224 : index
    %103 = vector.load %arg8[%c0_65, %c224] : memref<2x256xf32, #tpu.memory_space<vmem>>, vector<1x32xf32>
    tpu.vector_store %arg8[%c0_65, %c224], %102 {strides = array<i32>} : memref<2x256xf32, #tpu.memory_space<vmem>>, vector<1x32xf32>,
    %c8_66 = arith.constant 8 : index
    %c0_67 = arith.constant 0 : index
    %104 = vector.load %arg7[%c8_66, %c0_67] : memref<16x32xf32, #tpu.memory_space<vmem>>, vector<1x32xf32>
    %c1_68 = arith.constant 1 : index
    %c0_69 = arith.constant 0 : index
    %105 = vector.load %arg8[%c1_68, %c0_69] : memref<2x256xf32, #tpu.memory_space<vmem>>, vector<1x32xf32>
    tpu.vector_store %arg8[%c1_68, %c0_69], %104 {strides = array<i32>} : memref<2x256xf32, #tpu.memory_space<vmem>>, vector<1x32xf32>,
    %c9 = arith.constant 9 : index
    %c0_70 = arith.constant 0 : index
    %106 = vector.load %arg7[%c9, %c0_70] : memref<16x32xf32, #tpu.memory_space<vmem>>, vector<1x32xf32>
    %c1_71 = arith.constant 1 : index
    %c32_72 = arith.constant 32 : index
    %107 = vector.load %arg8[%c1_71, %c32_72] : memref<2x256xf32, #tpu.memory_space<vmem>>, vector<1x32xf32>
    tpu.vector_store %arg8[%c1_71, %c32_72], %106 {strides = array<i32>} : memref<2x256xf32, #tpu.memory_space<vmem>>, vector<1x32xf32>,
    %c10 = arith.constant 10 : index
    %c0_73 = arith.constant 0 : index
    %108 = vector.load %arg7[%c10, %c0_73] : memref<16x32xf32, #tpu.memory_space<vmem>>, vector<1x32xf32>
    %c1_74 = arith.constant 1 : index
    %c64_75 = arith.constant 64 : index
    %109 = vector.load %arg8[%c1_74, %c64_75] : memref<2x256xf32, #tpu.memory_space<vmem>>, vector<1x32xf32>
    tpu.vector_store %arg8[%c1_74, %c64_75], %108 {strides = array<i32>} : memref<2x256xf32, #tpu.memory_space<vmem>>, vector<1x32xf32>,
    %c11 = arith.constant 11 : index
    %c0_76 = arith.constant 0 : index
    %110 = vector.load %arg7[%c11, %c0_76] : memref<16x32xf32, #tpu.memory_space<vmem>>, vector<1x32xf32>
    %c1_77 = arith.constant 1 : index
    %c96_78 = arith.constant 96 : index
    %111 = vector.load %arg8[%c1_77, %c96_78] : memref<2x256xf32, #tpu.memory_space<vmem>>, vector<1x32xf32>
    tpu.vector_store %arg8[%c1_77, %c96_78], %110 {strides = array<i32>} : memref<2x256xf32, #tpu.memory_space<vmem>>, vector<1x32xf32>,
    %c12 = arith.constant 12 : index
    %c0_79 = arith.constant 0 : index
    %112 = vector.load %arg7[%c12, %c0_79] : memref<16x32xf32, #tpu.memory_space<vmem>>, vector<1x32xf32>
    %c1_80 = arith.constant 1 : index
    %c128_81 = arith.constant 128 : index
    %113 = vector.load %arg8[%c1_80, %c128_81] : memref<2x256xf32, #tpu.memory_space<vmem>>, vector<1x32xf32>
    tpu.vector_store %arg8[%c1_80, %c128_81], %112 {strides = array<i32>} : memref<2x256xf32, #tpu.memory_space<vmem>>, vector<1x32xf32>,
    %c13 = arith.constant 13 : index
    %c0_82 = arith.constant 0 : index
    %114 = vector.load %arg7[%c13, %c0_82] : memref<16x32xf32, #tpu.memory_space<vmem>>, vector<1x32xf32>
    %c1_83 = arith.constant 1 : index
    %c160_84 = arith.constant 160 : index
    %115 = vector.load %arg8[%c1_83, %c160_84] : memref<2x256xf32, #tpu.memory_space<vmem>>, vector<1x32xf32>
    tpu.vector_store %arg8[%c1_83, %c160_84], %114 {strides = array<i32>} : memref<2x256xf32, #tpu.memory_space<vmem>>, vector<1x32xf32>,
    %c14 = arith.constant 14 : index
    %c0_85 = arith.constant 0 : index
    %116 = vector.load %arg7[%c14, %c0_85] : memref<16x32xf32, #tpu.memory_space<vmem>>, vector<1x32xf32>
    %c1_86 = arith.constant 1 : index
    %c192_87 = arith.constant 192 : index
    %117 = vector.load %arg8[%c1_86, %c192_87] : memref<2x256xf32, #tpu.memory_space<vmem>>, vector<1x32xf32>
    tpu.vector_store %arg8[%c1_86, %c192_87], %116 {strides = array<i32>} : memref<2x256xf32, #tpu.memory_space<vmem>>, vector<1x32xf32>,
    %c15 = arith.constant 15 : index
    %c0_88 = arith.constant 0 : index
    %118 = vector.load %arg7[%c15, %c0_88] : memref<16x32xf32, #tpu.memory_space<vmem>>, vector<1x32xf32>
    %c1_89 = arith.constant 1 : index
    %c224_90 = arith.constant 224 : index
    %119 = vector.load %arg8[%c1_89, %c224_90] : memref<2x256xf32, #tpu.memory_space<vmem>>, vector<1x32xf32>
    tpu.vector_store %arg8[%c1_89, %c224_90], %118 {strides = array<i32>} : memref<2x256xf32, #tpu.memory_space<vmem>>, vector<1x32xf32>,
    %c9_91 = arith.constant 9 : index
    %c0_92 = arith.constant 0 : index
    %120 = vector.load %arg1[%c9_91, %c0_92] : memref<10x32xf32, #tpu.memory_space<vmem>>, vector<1x32xf32>
    %c0_93 = arith.constant 0 : index
    %c0_94 = arith.constant 0 : index
    %121 = vector.load %arg8[%c0_93, %c0_94] : memref<2x256xf32, #tpu.memory_space<vmem>>, vector<2x256xf32>
    %c0_95 = arith.constant 0 : index
    %c0_96 = arith.constant 0 : index
    %122 = vector.load %arg4[%c0_95, %c0_96] : memref<256x32xf32, #tpu.memory_space<vmem>>, vector<256x32xf32>
    %cst_97 = arith.constant dense<0.000000e+00> : vector<2x32xf32>
    %123 = tpu.matmul %121, %122, %cst_97 {dimension_numbers = #tpu.dot_dimension_numbers<[1], [0], [0], [1], [0, 0, 1, 1], [], []>} : vector<2x256xf32>, vector<256x32xf32>, vector<2x32xf32> -> vector<2x32xf32>
    %124 = vector.broadcast %120 : vector<1x32xf32> to vector<2x32xf32>
    %125 = arith.addf %123, %124 : vector<2x32xf32>
    %cst_98 = arith.constant 0.000000e+00 : f32
    %126 = vector.broadcast %cst_98 : f32 to vector<2x32xf32>
    %127 = arith.maximumf %125, %126 : vector<2x32xf32>
    %c0_99 = arith.constant 0 : index
    %c0_100 = arith.constant 0 : index
    %128 = vector.load %arg5[%c0_99, %c0_100] : memref<33x4xf32, #tpu.memory_space<vmem>>, vector<32x4xf32>
    %c32_101 = arith.constant 32 : index
    %c0_102 = arith.constant 0 : index
    %129 = vector.load %arg5[%c32_101, %c0_102] : memref<33x4xf32, #tpu.memory_space<vmem>>, vector<1x4xf32>
    %cst_103 = arith.constant dense<0.000000e+00> : vector<2x4xf32>
    %130 = tpu.matmul %127, %128, %cst_103 {dimension_numbers = #tpu.dot_dimension_numbers<[1], [0], [0], [1], [0, 0, 1, 1], [], []>} : vector<2x32xf32>, vector<32x4xf32>, vector<2x4xf32> -> vector<2x4xf32>
    %131 = vector.broadcast %129 : vector<1x4xf32> to vector<2x4xf32>
    %132 = arith.addf %130, %131 : vector<2x4xf32>
    %c0_104 = arith.constant 0 : index
    %c0_105 = arith.constant 0 : index
    %133 = vector.load %arg6[%c0_104, %c0_105] : memref<2x4xf32, #tpu.memory_space<vmem>>, vector<2x4xf32>
    tpu.vector_store %arg6[%c0_104, %c0_105], %132 {strides = array<i32>} : memref<2x4xf32, #tpu.memory_space<vmem>>, vector<2x4xf32>,
    return
  }
}

</mosaic_0001>

<bundles_post_ra>
// kernel: fan_gated_forecaster.1
= control target key start
LH: loop header
LB: loop body
LE: loop exit
PB: predicated region body
PF: predicated region fallthrough
CT: control target
= control target key end

     0   :  { %11 = vsyncpa [#allocation6], 0  ;;  %s2337_s0 = inlined_call_operand.vmem [shape: f32[16,1], index: 0, kind: input, shape index: {}]   ;;  %s2338_s1 = inlined_call_operand.vmem [shape: f32[10,32], index: 1, kind: input, shape index: {}]   ;;  %s2339_s2 = inlined_call_operand.vmem [shape: f32[2,33,24], index: 2, kind: input, shape index: {}]   ;;  %s2340_s3 = inlined_call_operand.vmem [shape: f32[1,2], index: 3, kind: input, shape index: {}]   ;;  %s2341_s4 = inlined_call_operand.vmem [shape: f32[256,32], index: 4, kind: input, shape index: {}]   ;;  %s2342_s5 = inlined_call_operand.vmem [shape: f32[33,4], index: 5, kind: input, shape index: {}]   ;;  %s2343_s6 = inlined_call_operand.hbm [shape: f32[2,4], index: 6, kind: output, shape index: {}]  }
   0x1   :  { %12 = vsyncpa [#allocation5], 0  ;;  %s25_s23 = sshll.u32 %s2340_s3, 4  ;;  %s26_s23 = int_to_ptr.vmem [resolvable:$true] %s25_s23 }
   0x2   :  { %s1840_s24 = scalar_lea.vmem %s26_s23, 16  ;;  %p1845_p1 = scmp.lt.s32.totalorder %s26_s23, %s26_s23 }
   0x3   :  { %p1841_p0 = scmp.ne.s32.totalorder %s26_s23, %s1840_s24  ;;  %p1846_p2 = scmp.lt.s32.totalorder %s1840_s24, %s1840_s24 }
   0x5   :  { %p1847_p3 = por %p1846_p2, %p1845_p1 }
   0x7   :  { %p1848_p4 = pnand %p1847_p3, %p1841_p0 }
   0x9   :  { %1851 = shalt.err (!%p1848_p4)
}
   0xa   :  { %s1878_s25 = smov [#allocation4]  }
   0xb   :  { %28 = dma.vmem_to_smem %s26_s23, 16, %s1878_s25, [#allocation6]  }
   0xc   :  { %1874 = dma.done.wait [#allocation6], 16  }
   0xd   :  { %1875 = vsyncadd [#allocation6], 4294967280 }
   0xe   :  { %36 = sfence }
   0xf   :  { %v39_v0 = vld [vmem:[%s2337_s0] sm:$0xff]  ;;  %v1879_v1 = vmov 0   ;;  %v53_v2 = vld [vmem:[%s2337_s0 + $0x8] sm:$0xff]  ;;  %v66_v6 = vld [vmem:[%s2339_s2 + $0x10] sm:$0xff]  ;;  %s164_s0 = sld [smem:[#allocation4]]  ;;  %vm51_vm0 = vcmask 261120  }
  0x10   :  { %1807 = vset.pattern.permute.xlu0 %v1879_v1  ;;  %v64_v3 = vld [vmem:[%s2339_s2] sm:$0xff]  ;;  %v65_v4 = vld [vmem:[%s2339_s2 + $0x8] sm:$0xff]  ;;  %v67_v7 = vld [vmem:[%s2339_s2 + $0x18] sm:$0xff]  ;;  %v1880_v57 = vmov 683565275   ;;  %s1886_s24 = smov 8  }
  0x11   :  { %42 = vperm.xlu0 %1807, %v39_v0   ;;  %v1713_v5 = vpack.c.bf16 %v65_v4, %v64_v3  ;;  %v1717_v8 = vpack.c.bf16 %v67_v7, %v66_v6  ;;  %v1567_v14 = vld [vmem:[%s2338_s1 + $0x8] ss:$0 sm:$0xff]  ;;  %v37_v16 = vld [vmem:[%s2338_s1] sm:$0xff]  ;;  %v1881_v59 = vmov 2475754826   ;;  %s1595_s8 = sld [smem:[#allocation4 + $0x1]] }
  0x12   :  { %v1568_v24 = vld [vmem:[%s2339_s2 + $0x20] ss:$0 sm:$0xff]  ;;  %v1882_v61 = vmov 2131351028   ;;  %v1883_v1 = vmov 2102212464  }
  0x13   :  { %1714 = vmatprep.subr.bf16.mxu1 %v1713_v5  ;;  %v1884_v3 = vmov 920167782   ;;  %s1889_s27 = smov 96  }
  0x14   :  { %1716 = vmatpush3.bf16.msra.mxu1 %v1713_v5 }
  0x15   :  { %56 = vperm.xlu0 %1807, %v53_v2   ;;  %1718 = vmatprep.subr.bf16.mxu1 %v1717_v8  ;;  %s165_s13 = sxor.u32 2147483648, %s164_s0  ;;  %s1893_s0 = smov [#allocation7]  }
  0x16   :  { %v166_v9 = vstv %s165_s13 }
  0x17   :  { %v167_v10 = vmul.f32 1.442695, %v166_v9  ;;  %s726_s9 = sxor.u32 2147483648, %s1595_s8 }
  0x18   :  { %1720 = vmatpush3.bf16.msra.mxu1 %v1717_v8  ;;  %v1885_v8 = vmov 1326507024  }
  0x19   :  { %1808 = vpow2.f32 %v167_v10 }
  0x23   :  { %v1809_v11 = vpop.eup %1808 }
  0x24   :  { %1767 = vpush %v1809_v11 }
  0x55   :  { %s1768_s14 = spop %1767 }
  0x56   :  { %s170_s15 = sadd.f32 1.0, %s1768_s14 }
  0x58   :  { %v171_v12 = vstv %s170_s15  ;;  %s1887_s15 = smov 32  }
  0x59   :  { %1810 = vrcp.f32 %v171_v12 }
  0x63   :  { %v1811_v13 = vpop.eup %1810 }
  0x64   :  { %1769 = vpush %v1811_v13 }
  0x90   :  { %v43_v15 = vpop.permute.xlu0 %42 }
  0x91   :  { %v49_v17 = vmul.f32 %v1567_v14, %v43_v15 }
  0x93   :  { %v50_v18 = vadd.f32 %v49_v17, %v37_v16 }
  0x94   :  { %v57_v19 = vpop.permute.xlu0 %56 }
  0x95   :  { %52 = vst.msk [vmem:[#allocation2] sm:$0xff] %vm51_vm0, %v50_v18  ;;  %v59_v20 = vmul.f32 %v1567_v14, %v57_v19  ;;  %s1974_s22 = spop %1769 }
  0x96   :  { %s607_s23 = ssub.f32 1.0, %s1974_s22 }
  0x97   :  { %v60_v21 = vadd.f32 %v59_v20, %v37_v16 }
  0x98   :  { %v1986_v49 = vstv %s607_s23 }
  0x99   :  { %61 = vst.msk [vmem:[#allocation2 + $0x8] sm:$0xff] %vm51_vm0, %v60_v21 }
  0x9c   :  { %v62_v22 = vld [vmem:[#allocation2] sm:$0xff] }
  0x9d   :  { %1688 = vmatprep.mubr.msk.f32.mxu1 %vm51_vm0, %v62_v22 }
  0xa0   :  { %v63_v23 = vld [vmem:[#allocation2 + $0x8] sm:$0xff] }
  0xa1   :  { %1689 = vmatmul.mubr.msk.f32.vlgmr.msra.gmra.mrb[0].mxu1 %vm51_vm0, %v63_v23 }
 0x174   :  { %v1690_v25 = vpop.f32.mrb[0].mxu1 }
 0x175   :  { %v1963_v26 = vadd.f32 %v1690_v25, %v1568_v24  ;;  %v145_v27 = vpop.f32.mrb[1].mxu1 }
 0x176   :  { %v1965_v28 = vadd.f32 %v1568_v24, %v145_v27 }
 0x177   :  { %v280_v29 = vand.u32 2139095040, %v1963_v26  ;;  %v277_v37 = vand.u32 2147483647, %v1963_v26 }
 0x178   :  { %v177_v30 = vand.u32 2139095040, %v1965_v28  ;;  %v156_v31 = vmul.f32 0.70710677, %v1965_v28  ;;  %v174_v32 = vand.u32 2147483647, %v1965_v28  ;;  %v154_v47 = vmul.f32 0.5, %v1965_v28 }
 0x179   :  { %v281_v33 = vshrl.u32 %v280_v29, 23  ;;  %v1979_v42 = vand.u32 8388607, %v277_v37  ;;  %vm176_vm15 = vcmp.lt.s32.totalorder %v1965_v28, 0 }
 0x17a   :  { %v178_v34 = vshrl.u32 %v177_v30, 23  ;;  %1812 = verf.f32 %v156_v31  ;;  %v181_v36 = vand.u32 8388607, %v174_v32 }
 0x17b   :  { %v1575_v35 = vadd.s32 4294967169, %v281_v33  ;;  %v285_v50 = vor.u32 8388608, %v1979_v42 }
 0x17c   :  { %v1571_v38 = vadd.s32 4294967169, %v178_v34  ;;  %v182_v41 = vor.u32 8388608, %v181_v36 }
 0x17d   :  { %v287_v39 = vadd.s32 1, %v1575_v35 }
 0x17e   :  { %v184_v40 = vadd.s32 1, %v1571_v38  ;;  %v1984_v48 = vshll.u32 %v182_v41, 8 }
 0x17f   :  { %vm288_vm1 = vcmp.gt.s32.totalorder %v287_v39, 0 }
 0x180   :  { %v289_v43 = vsel %vm288_vm1, %v287_v39, 0  ;;  %vm185_vm2 = vcmp.gt.s32.totalorder %v184_v40, 0  ;;  %vm175_vm1 = vcmp.le.f32.partialorder %v174_v32, 0.7853982 }
 0x181   :  { %v1981_v44 = vand.u32 31, %v289_v43  ;;  %v186_v45 = vsel %vm185_vm2, %v184_v40, 0  ;;  %v1989_v52 = vshrl.u32 %v289_v43, 5  ;;  %vm279_vm2 = vcmp.lt.s32.totalorder %v1963_v26, 0 }
 0x182   :  { %v188_v46 = vand.u32 31, %v186_v45  ;;  %v187_v53 = vshrl.u32 %v186_v45, 5 }
 0x183   :  { %v1992_v55 = vsub.s32 32, %v1981_v44  ;;  %v294_v13 = vshll.u32 %v1880_v57, %v1981_v44  ;;  %v297_v25 = vshll.u32 %v1881_v59, %v1981_v44  ;;  %v300_v40 = vshll.u32 %v1882_v61, %v1981_v44 }
 0x184   :  { %v1813_v51 = vpop.eup %1812  ;;  %v189_v54 = vsub.s32 32, %v188_v46  ;;  %v191_v58 = vshll.u32 %v1880_v57, %v188_v46  ;;  %v194_v60 = vshll.u32 %v1881_v59, %v188_v46  ;;  %v197_v62 = vshll.u32 %v1882_v61, %v188_v46 }
 0x185   :  { %v160_v56 = vadd.f32 1.0, %v1813_v51  ;;  %v200_v2 = vshll.u32 %v1883_v1, %v188_v46  ;;  %v203_v4 = vshll.u32 %v1884_v3, %v188_v46  ;;  %vm206_vm3 = vcmp.lt.s32.totalorder %v187_v53, 1 }
 0x186   :  { %v192_v63 = vshrl.u32 %v1881_v59, %v189_v54  ;;  %v195_v0 = vshrl.u32 %v1882_v61, %v189_v54  ;;  %v198_v6 = vshrl.u32 %v1883_v1, %v189_v54  ;;  %v201_v7 = vshrl.u32 %v1884_v3, %v189_v54 }
 0x187   :  { %v162_v5 = vmul.f32 %v160_v56, %v154_v47  ;;  %v204_v9 = vshrl.u32 %v1885_v8, %v189_v54  ;;  %v190_v10 = vshrl.u32 %v1880_v57, %v189_v54  ;;  %vm208_vm4 = vcmp.lt.s32.totalorder %v187_v53, 3 }
 0x188   :  { %v193_v11 = vor.u32 %v192_v63, %v191_v58  ;;  %v196_v12 = vor.u32 %v195_v0, %v194_v60  ;;  %v199_v14 = vor.u32 %v198_v6, %v197_v62  ;;  %v202_v15 = vor.u32 %v201_v7, %v200_v2 }
 0x189   :  { %v205_v16 = vor.u32 %v204_v9, %v203_v4  ;;  %vm209_vm5 = vcmp.lt.s32.totalorder %v187_v53, 4  ;;  %v609_v18 = vmul.f32 %v1986_v49, %v162_v5  ;;  %vm207_vm6 = vcmp.lt.s32.totalorder %v187_v53, 2 }
 0x18a   :  { %v214_v17 = vsel %vm206_vm3, %v193_v11, %v196_v12  ;;  %v211_v19 = vsel %vm209_vm5, %v199_v14, 2102212464  ;;  %v215_v20 = vsel %vm209_vm5, %v202_v15, 920167782  ;;  %v218_v21 = vsel %vm206_vm3, %v196_v12, %v199_v14 }
 0x18b   :  { %v219_v22 = vsel %vm209_vm5, %v205_v16, 1326507024  ;;  %v216_v23 = vsel %vm208_vm4, %v199_v14, %v215_v20  ;;  %613 = vrot.lane.b32.xlu0 %v609_v18, %s1886_s24  ;;  %v210_v27 = vsel %vm206_vm3, %v190_v10, %v193_v11  ;;  %v212_v29 = vsel %vm208_vm4, %v196_v12, %v211_v19 }
 0x18c   :  { %v220_v24 = vsel %vm208_vm4, %v202_v15, %v219_v22  ;;  %v217_v30 = vsel %vm207_vm6, %v214_v17, %v216_v23  ;;  %v295_v38 = vshrl.u32 %v1881_v59, %v1992_v55  ;;  %v298_v39 = vshrl.u32 %v1882_v61, %v1992_v55 }
 0x18d   :  { %v221_v31 = vsel %vm207_vm6, %v218_v21, %v220_v24  ;;  %v2018_v35 = vmul.u32.u64.low %v1984_v48, %v217_v30  ;;  %v2019_v36 = vmul.u32.u64.high %v1984_v48, %v217_v30, %v2018_v35  ;;  %v301_v41 = vshrl.u32 %v1883_v1, %v1992_v55 }
 0x18e   :  { %v2014_v33 = vmul.u32.u64.low %v1984_v48, %v221_v31  ;;  %v2015_v34 = vmul.u32.u64.high %v1984_v48, %v221_v31, %v2014_v33  ;;  %v213_v43 = vsel %vm207_vm6, %v210_v27, %v212_v29  ;;  %v303_v45 = vshll.u32 %v1883_v1, %v1981_v44 }
 0x18f   :  { %v304_v46 = vshrl.u32 %v1884_v3, %v1992_v55  ;;  %v307_v47 = vshrl.u32 %v1885_v8, %v1992_v55  ;;  %v296_v51 = vor.u32 %v295_v38, %v294_v13  ;;  %v299_v54 = vor.u32 %v298_v39, %v297_v25 }
 0x190   :  { %v302_v56 = vor.u32 %v301_v41, %v300_v40  ;;  %v306_v58 = vshll.u32 %v1884_v3, %v1981_v44  ;;  %vm231_vm7 = vc.u32 %v2015_v34, %v2018_v35  ;;  %v232_v53 = vadd.s32 1, %v2019_v36 }
 0x191   :  { %v305_v60 = vor.u32 %v304_v46, %v303_v45  ;;  %v325_v62 = vshll.u32 %v285_v50, 8  ;;  %v229_v63 = vmul.u32 %v1984_v48, %v213_v43  ;;  %vm309_vm8 = vcmp.lt.s32.totalorder %v1989_v52, 1 }
 0x192   :  { %v308_v0 = vor.u32 %v307_v47, %v306_v58  ;;  %vm312_vm9 = vcmp.lt.s32.totalorder %v1989_v52, 4  ;;  %v233_v2 = vsel %vm231_vm7, %v232_v53, %v2019_v36  ;;  %v293_v44 = vshrl.u32 %v1880_v57, %v1992_v55 }
 0x193   :  { %v314_v4 = vsel %vm312_vm9, %v302_v56, 2102212464  ;;  %v317_v5 = vsel %vm309_vm8, %v296_v51, %v299_v54  ;;  %v234_v6 = vadd.s32 %v233_v2, %v229_v63  ;;  %vm311_vm10 = vcmp.lt.s32.totalorder %v1989_v52, 3 }
 0x194   :  { %v318_v7 = vsel %vm312_vm9, %v305_v60, 920167782  ;;  %v321_v42 = vsel %vm309_vm8, %v299_v54, %v302_v56  ;;  %vm310_vm11 = vcmp.lt.s32.totalorder %v1989_v52, 2  ;;  %v313_v48 = vsel %vm309_vm8, %v293_v44, %v296_v51 }
 0x195   :  { %v319_v50 = vsel %vm311_vm10, %v302_v56, %v318_v7  ;;  %v322_v9 = vsel %vm312_vm9, %v308_v0, 1326507024  ;;  %v235_v10 = vadd.s32 536870912, %v234_v6  ;;  %v315_v11 = vsel %vm311_vm10, %v299_v54, %v314_v4 }
 0x196   :  { %v320_v12 = vsel %vm310_vm11, %v317_v5, %v319_v50  ;;  %v323_v13 = vsel %vm311_vm10, %v305_v60, %v322_v9  ;;  %v316_v19 = vsel %vm310_vm11, %v313_v48, %v315_v11  ;;  %v230_v40 = vadd.s32 %v2018_v35, %v2015_v34 }
 0x197   :  { %v324_v14 = vsel %vm310_vm11, %v321_v42, %v323_v13  ;;  %v2052_v15 = vmul.u32.u64.low %v325_v62, %v320_v12  ;;  %v2053_v16 = vmul.u32.u64.high %v325_v62, %v320_v12, %v2052_v15  ;;  %v236_v55 = vshrl.u32 %v235_v10, 30 }
 0x198   :  { %v2055_v17 = vmul.u32.u64.low %v325_v62, %v324_v14  ;;  %v2056_v18 = vmul.u32.u64.high %v325_v62, %v324_v14, %v2055_v17  ;;  %v332_v22 = vmul.u32 %v325_v62, %v316_v19  ;;  %vm278_vm3 = vcmp.le.f32.partialorder %v277_v37, 0.7853982 }
 0x199   :  { %v237_v20 = vshll.u32 %v236_v55, 30  ;;  %v335_v21 = vadd.s32 1, %v2053_v16  ;;  %v260_v44 = vsub.s32 4, %v236_v55  ;;  %vm266_vm10 = vweird.f32 %v1965_v28 }
 0x19a   :  { %vm334_vm12 = vc.u32 %v2056_v18, %v2052_v15  ;;  %v333_v34 = vadd.s32 %v2052_v15, %v2056_v18  ;;  %vm383_vm11 = vcmask 64512  }
 0x19b   :  { %v238_v52 = vsub.s32 %v234_v6, %v237_v20  ;;  %v336_v23 = vsel %vm334_vm12, %v335_v21, %v2053_v16  ;;  %v261_v9 = vsel %vm176_vm15, %v260_v44, %v236_v55  ;;  %v157_v20 = vmul.f32 0.70710677, %v1963_v26 }
 0x19c   :  { %v337_v25 = vadd.s32 %v336_v23, %v332_v22  ;;  %v263_v13 = vsel %vm175_vm1, 0, %v261_v9 }
 0x19d   :  { %v240_v24 = vsub.s32 0, %v238_v52  ;;  %v479_v17 = vadd.s32 3, %v263_v13  ;;  %v267_v21 = vand.u32 3, %v263_v13 }
 0x19e   :  { %v338_v29 = vadd.s32 536870912, %v337_v25 }
 0x19f   :  { %v1572_v27 = vmin.u32 %v240_v24, %v238_v52  ;;  %v480_v55 = vand.u32 3, %v479_v17  ;;  %vm272_vm4 = vcmp.eq.s32.totalorder %v267_v21, 2  ;;  %vm269_vm6 = vcmp.eq.s32.totalorder %v267_v21, 0 }
 0x1a0   :  { %v339_v31 = vshrl.u32 %v338_v29, 30  ;;  %v380_v29 = vstv %s1974_s22  ;;  %vm268_vm8 = vcmp.lt.s32.totalorder %v267_v21, 2 }
 0x1a1   :  { %v242_v30 = vclz %v1572_v27  ;;  %vm485_vm5 = vcmp.eq.s32.totalorder %v480_v55, 2  ;;  %vm482_vm7 = vcmp.eq.s32.totalorder %v480_v55, 0  ;;  %vm481_vm9 = vcmp.lt.s32.totalorder %v480_v55, 2 }
 0x1a2   :  { %v340_v36 = vshll.u32 %v339_v31, 30  ;;  %v363_v19 = vsub.s32 4, %v339_v31 }
 0x1a3   :  { %v1573_v33 = vadd.s32 4294967294, %v242_v30 }
 0x1a4   :  { %v341_v39 = vsub.s32 %v337_v25, %v340_v36  ;;  %v364_v22 = vsel %vm279_vm2, %v363_v19, %v339_v31 }
 0x1a5   :  { %vm1574_vm13 = vcmp.lt.s32.totalorder %v1573_v33, 0 }
 0x1a6   :  { %v245_v38 = vsel %vm1574_vm13, 0, %v1573_v33  ;;  %v343_v45 = vsub.s32 0, %v341_v39  ;;  %v366_v33 = vsel %vm278_vm3, 0, %v364_v22 }
 0x1a7   :  { %v246_v41 = vsub.s32 32, %v245_v38  ;;  %v250_v43 = vsub.s32 4294967266, %v245_v38  ;;  %v247_v46 = vshll.u32 %v238_v52, %v245_v38 }
 0x1a8   :  { %v1576_v54 = vmin.u32 %v343_v45, %v341_v39 }
 0x1a9   :  { %v248_v47 = vshrl.u32 %v230_v40, %v246_v41  ;;  %v251_v51 = vadd.s32 127, %v250_v43  ;;  %v583_v40 = vadd.s32 3, %v366_v33 }
 0x1aa   :  { %v345_v53 = vclz %v1576_v54 }
 0x1ab   :  { %v249_v56 = vor.u32 %v248_v47, %v247_v46  ;;  %v252_v58 = vshll.u32 %v251_v51, 23  ;;  %v370_v47 = vand.u32 3, %v366_v33  ;;  %v584_v51 = vand.u32 3, %v583_v40 }
 0x1ac   :  { %v1577_v62 = vadd.s32 4294967294, %v345_v53 }
 0x1ad   :  { %v253_v60 = vor.u32 4788187, %v252_v58  ;;  %v256_v0 = vcvt.s32.f32 %v249_v56  ;;  %vm371_vm12 = vcmp.lt.s32.totalorder %v370_v47, 2  ;;  %vm375_vm13 = vcmp.eq.s32.totalorder %v370_v47, 2 }
 0x1ae   :  { %vm1578_vm14 = vcmp.lt.s32.totalorder %v1577_v62, 0 }
 0x1af   :  { %v254_v63 = vand.u32 2147483647, %v253_v60  ;;  %v348_v4 = vsel %vm1578_vm14, 0, %v1577_v62  ;;  %vm589_vm14 = vcmp.eq.s32.totalorder %v584_v51, 2 }
 0x1b0   :  { %v349_v35 = vsub.s32 32, %v348_v4  ;;  %v353_v5 = vsub.s32 4294967266, %v348_v4  ;;  %v350_v7 = vshll.u32 %v341_v39, %v348_v4 }
 0x1b1   :  { %v257_v2 = vmul.f32 %v256_v0, %v254_v63  ;;  %v1587_v63 = vld [vmem:[%s2339_s2 + $0x28] sm:$0xff]  ;;  %v1588_v0 = vld [vmem:[%s2339_s2 + $0x30] sm:$0xff] }
 0x1b2   :  { %v351_v42 = vshrl.u32 %v333_v34, %v349_v35  ;;  %v354_v48 = vadd.s32 127, %v353_v5  ;;  %v1721_v4 = vpack.c.bf16 %v1588_v0, %v1587_v63  ;;  %v1589_v34 = vld [vmem:[%s2339_s2 + $0x38] sm:$0xff]  ;;  %v1590_v35 = vld [vmem:[%s2339_s2 + $0x40] sm:$0xff] }
 0x1b3   :  { %v258_v6 = vxor.u32 2147483648, %v257_v2 }
 0x1b4   :  { %v352_v11 = vor.u32 %v351_v42, %v350_v7  ;;  %v355_v12 = vshll.u32 %v354_v48, 23  ;;  %v1725_v7 = vpack.c.bf16 %v1590_v35, %v1589_v34  ;;  %1722 = vmatprep.subr.bf16.mxu1 %v1721_v4 }
 0x1b5   :  { %v259_v50 = vsel %vm176_vm15, %v258_v6, %v257_v2  ;;  %vm372_vm15 = vcmp.eq.s32.totalorder %v370_v47, 0  ;;  %1724 = vmatpush3.bf16.msra.mxu1 %v1721_v4 }
 0x1b6   :  { %v262_v10 = vsel %vm175_vm1, %v1965_v28, %v259_v50  ;;  %v356_v14 = vor.u32 4788187, %v355_v12  ;;  %v359_v16 = vcvt.s32.f32 %v352_v11  ;;  %vm586_vm1 = vcmp.eq.s32.totalorder %v584_v51, 0  ;;  %1726 = vmatprep.subr.bf16.mxu1 %v1725_v7 }
 0x1b7   :  { %1814 = vcosq.f32 %v262_v10  ;;  %v155_v11 = vmul.f32 0.5, %v1963_v26 }
 0x1b8   :  { %1816 = vsinq.f32 %v262_v10  ;;  %v357_v15 = vand.u32 2147483647, %v356_v14 }
 0x1b9   :  { %1818 = verf.f32 %v157_v20  ;;  %1728 = vmatpush3.bf16.msra.mxu1 %v1725_v7 }
 0x1ba   :  { %v360_v18 = vmul.f32 %v359_v16, %v357_v15  ;;  %v727_v15 = vstv %s726_s9 }
 0x1bb   :  { %v728_v16 = vmul.f32 1.442695, %v727_v15 }
 0x1bc   :  { %v361_v32 = vxor.u32 2147483648, %v360_v18 }
 0x1be   :  { %v362_v52 = vsel %vm279_vm2, %v361_v32, %v360_v18  ;;  %vm585_vm2 = vcmp.lt.s32.totalorder %v584_v51, 2 }
 0x1bf   :  { %v365_v24 = vsel %vm278_vm3, %v1963_v26, %v362_v52  ;;  %vm369_vm3 = vweird.f32 %v1963_v26  ;;  %v1592_v52 = vld [vmem:[%s2339_s2 + $0x48] ss:$0 sm:$0xff] }
 0x1c0   :  { %1820 = vcosq.f32 %v365_v24 }
 0x1c1   :  { %v1815_v23 = vpop.eup %1814  ;;  %1822 = vsinq.f32 %v365_v24 }
 0x1c2   :  { %v1817_v25 = vpop.eup %1816  ;;  %v273_v27 = vxor.u32 2147483648, %v1815_v23  ;;  %1824 = vpow2.f32 %v728_v16 }
 0x1c3   :  { %v270_v30 = vxor.u32 2147483648, %v1817_v25  ;;  %v1819_v54 = vpop.eup %1818 }
 0x1c4   :  { %v274_v36 = vsel %vm272_vm4, %v273_v27, %v1817_v25  ;;  %v487_v38 = vsel %vm485_vm5, %v273_v27, %v1817_v25  ;;  %v161_v50 = vadd.f32 1.0, %v1819_v54  ;;  %vm604_vm4 = vcmask 130112  }
 0x1c5   :  { %v271_v37 = vsel %vm269_vm6, %v1815_v23, %v270_v30  ;;  %v484_v31 = vsel %vm482_vm7, %v1815_v23, %v270_v30  ;;  %vm619_vm5 = vcmask 261248  }
 0x1c6   :  { %v275_v39 = vsel %vm268_vm8, %v271_v37, %v274_v36  ;;  %v488_v41 = vsel %vm481_vm9, %v484_v31, %v487_v38  ;;  %v163_v12 = vmul.f32 %v161_v50, %v155_v11 }
 0x1c7   :  { %v276_v43 = vsel %vm266_vm10, nan, %v275_v39  ;;  %v489_v45 = vsel %vm266_vm10, nan, %v488_v41 }
 0x1c8   :  { %v381_v46 = vmul.f32 %v380_v29, %v276_v43  ;;  %v594_v13 = vmul.f32 %v489_v45, %v380_v29  ;;  %v610_v14 = vmul.f32 %v1986_v49, %v163_v12 }
 0x1ca   :  { %384 = vst.msk [vmem:[#allocation2] sm:$0xff] %vm383_vm11, %v381_v46  ;;  %v1821_v56 = vpop.eup %1820 }
 0x1cb   :  { %v1823_v58 = vpop.eup %1822  ;;  %v376_v53 = vxor.u32 2147483648, %v1821_v56 }
 0x1cc   :  { %v373_v60 = vxor.u32 2147483648, %v1823_v58  ;;  %v1825_v17 = vpop.eup %1824 }
 0x1cd   :  { %v591_v28 = vsel %vm589_vm14, %v376_v53, %v1823_v58  ;;  %v377_v62 = vsel %vm375_vm13, %v376_v53, %v1823_v58  ;;  %1779 = vpush %v1825_v17 }
 0x1ce   :  { %v588_v2 = vsel %vm586_vm1, %v1821_v56, %v373_v60  ;;  %v374_v44 = vsel %vm372_vm15, %v1821_v56, %v373_v60 }
 0x1cf   :  { %v592_v5 = vsel %vm585_vm2, %v588_v2, %v591_v28  ;;  %v378_v6 = vsel %vm371_vm12, %v374_v44, %v377_v62 }
 0x1d0   :  { %v593_v42 = vsel %vm369_vm3, nan, %v592_v5  ;;  %v379_v48 = vsel %vm369_vm3, nan, %v378_v6 }
 0x1d1   :  { %v595_v9 = vmul.f32 %v593_v42, %v380_v29  ;;  %v382_v10 = vmul.f32 %v380_v29, %v379_v48 }
 0x1d3   :  { %600 = vrot.lane.b32.xlu1 %v595_v9, %s1886_s24  ;;  %385 = vst.msk [vmem:[#allocation2 + $0x8] sm:$0xff] %vm383_vm11, %v382_v10 }
 0x1d7   :  { %598 = vrot.lane.b32.xlu1 %v594_v13, %s1886_s24 }
 0x1db   :  { %615 = vrot.lane.b32.xlu1 %v610_v14, %s1886_s24 }
 0x1fd   :  { %v614_v20 = vpop.permute.xlu0 %613 }
 0x1fe   :  { %s1780_s10 = spop %1779 }
 0x1ff   :  { %s731_s11 = sadd.f32 1.0, %s1780_s10 }
 0x201   :  { %v732_v26 = vstv %s731_s11 }
 0x202   :  { %1826 = vrcp.f32 %v732_v26 }
 0x20c   :  { %v1827_v18 = vpop.eup %1826 }
 0x20d   :  { %1781 = vpush %v1827_v18 }
 0x23e   :  { %s2180_s2 = spop %1781 }
 0x23f   :  { %s1166_s13 = ssub.f32 1.0, %s2180_s2 }
 0x245   :  { %v601_v19 = vpop.permute.xlu1 %600 }
 0x246   :  { %606 = vst.msk [vmem:[#allocation2 + $0x8] sm:$0xff] %vm604_vm4, %v601_v19 }
 0x249   :  { %v599_v49 = vpop.permute.xlu1 %598 }
 0x24a   :  { %605 = vst.msk [vmem:[#allocation2] sm:$0xff] %vm604_vm4, %v599_v49 }
 0x24b   :  { %620 = vst.msk [vmem:[#allocation2] sm:$0xff] %vm619_vm5, %v614_v20 }
 0x24d   :  { %v616_v21 = vpop.permute.xlu1 %615 }
 0x24e   :  { %621 = vst.msk [vmem:[#allocation2 + $0x8] sm:$0xff] %vm619_vm5, %v616_v21 }
 0x252   :  { %v622_v32 = vld [vmem:[#allocation2] sm:$0xff] }
 0x253   :  { %1699 = vmatprep.mubr.msk.f32.mxu1 %vm51_vm0, %v622_v32 }
 0x255   :  { %v623_v55 = vld [vmem:[#allocation2 + $0x8] sm:$0xff] }
 0x256   :  { %1700 = vmatmul.mubr.msk.f32.vlgmr.msra.gmra.mrb[2].mxu1 %vm51_vm0, %v623_v55 }
 0x329   :  { %v1701_v22 = vpop.f32.mrb[2].mxu1 }
 0x32a   :  { %v2105_v23 = vadd.f32 %v1701_v22, %v1592_v52  ;;  %v706_v24 = vpop.f32.mrb[3].mxu1 }
 0x32b   :  { %v2107_v25 = vadd.f32 %v1592_v52, %v706_v24 }
 0x32c   :  { %v841_v27 = vand.u32 2139095040, %v2105_v23  ;;  %v838_v31 = vand.u32 2147483647, %v2105_v23 }
 0x32d   :  { %v738_v29 = vand.u32 2139095040, %v2107_v25  ;;  %v735_v30 = vand.u32 2147483647, %v2107_v25 }
 0x32e   :  { %v842_v33 = vshrl.u32 %v841_v27, 23  ;;  %v845_v45 = vand.u32 8388607, %v838_v31 }
 0x32f   :  { %v739_v36 = vshrl.u32 %v738_v29, 23  ;;  %v742_v37 = vand.u32 8388607, %v735_v30 }
 0x330   :  { %v1600_v38 = vadd.s32 4294967169, %v842_v33  ;;  %v846_v58 = vor.u32 8388608, %v845_v45 }
 0x331   :  { %v1596_v39 = vadd.s32 4294967169, %v739_v36  ;;  %v743_v43 = vor.u32 8388608, %v742_v37 }
 0x332   :  { %v848_v40 = vadd.s32 1, %v1600_v38 }
 0x333   :  { %v745_v41 = vadd.s32 1, %v1596_v39  ;;  %v2117_v56 = vshll.u32 %v743_v43, 8  ;;  %v886_v43 = vshll.u32 %v846_v58, 8 }
 0x334   :  { %vm849_vm6 = vcmp.gt.s32.totalorder %v848_v40, 0 }
 0x335   :  { %v850_v46 = vsel %vm849_vm6, %v848_v40, 0  ;;  %vm746_vm7 = vcmp.gt.s32.totalorder %v745_v41, 0 }
 0x336   :  { %v852_v47 = vand.u32 31, %v850_v46  ;;  %v747_v51 = vsel %vm746_vm7, %v745_v41, 0  ;;  %v2119_v53 = vshrl.u32 %v850_v46, 5 }
 0x337   :  { %v749_v54 = vand.u32 31, %v747_v51  ;;  %v748_v28 = vshrl.u32 %v747_v51, 5 }
 0x338   :  { %v853_v60 = vsub.s32 32, %v852_v47  ;;  %v855_v2 = vshll.u32 %v1880_v57, %v852_v47  ;;  %v858_v44 = vshll.u32 %v1881_v59, %v852_v47  ;;  %v861_v37 = vshll.u32 %v1882_v61, %v852_v47 }
 0x339   :  { %v750_v62 = vsub.s32 32, %v749_v54  ;;  %v752_v63 = vshll.u32 %v1880_v57, %v749_v54  ;;  %v755_v0 = vshll.u32 %v1881_v59, %v749_v54  ;;  %v758_v35 = vshll.u32 %v1882_v61, %v749_v54 }
 0x33a   :  { %v761_v5 = vshll.u32 %v1883_v1, %v749_v54  ;;  %v764_v42 = vshll.u32 %v1884_v3, %v749_v54  ;;  %vm767_vm8 = vcmp.lt.s32.totalorder %v748_v28, 1  ;;  %vm768_vm9 = vcmp.lt.s32.totalorder %v748_v28, 2 }
 0x33b   :  { %v753_v4 = vshrl.u32 %v1881_v59, %v750_v62  ;;  %v756_v34 = vshrl.u32 %v1882_v61, %v750_v62  ;;  %v759_v6 = vshrl.u32 %v1883_v1, %v750_v62  ;;  %v762_v7 = vshrl.u32 %v1884_v3, %v750_v62 }
 0x33c   :  { %v765_v48 = vshrl.u32 %v1885_v8, %v750_v62  ;;  %v751_v50 = vshrl.u32 %v1880_v57, %v750_v62  ;;  %vm769_vm10 = vcmp.lt.s32.totalorder %v748_v28, 3  ;;  %vm770_vm12 = vcmp.lt.s32.totalorder %v748_v28, 4 }
 0x33d   :  { %v754_v9 = vor.u32 %v753_v4, %v752_v63  ;;  %v757_v10 = vor.u32 %v756_v34, %v755_v0  ;;  %v760_v11 = vor.u32 %v759_v6, %v758_v35  ;;  %v763_v12 = vor.u32 %v762_v7, %v761_v5 }
 0x33e   :  { %v766_v13 = vor.u32 %v765_v48, %v764_v42  ;;  %v856_v21 = vshrl.u32 %v1881_v59, %v853_v60  ;;  %v859_v22 = vshrl.u32 %v1882_v61, %v853_v60  ;;  %v862_v39 = vshrl.u32 %v1883_v1, %v853_v60 }
 0x33f   :  { %v771_v14 = vsel %vm767_vm8, %v751_v50, %v754_v9  ;;  %v775_v15 = vsel %vm767_vm8, %v754_v9, %v757_v10  ;;  %v772_v16 = vsel %vm770_vm12, %v760_v11, 2102212464  ;;  %v776_v17 = vsel %vm770_vm12, %v763_v12, 920167782 }
 0x340   :  { %v779_v26 = vsel %vm767_vm8, %v757_v10, %v760_v11  ;;  %v780_v18 = vsel %vm770_vm12, %v766_v13, 1326507024  ;;  %v773_v19 = vsel %vm769_vm10, %v757_v10, %v772_v16  ;;  %v777_v49 = vsel %vm769_vm10, %v760_v11, %v776_v17 }
 0x341   :  { %v781_v20 = vsel %vm769_vm10, %v763_v12, %v780_v18  ;;  %v774_v32 = vsel %vm768_vm9, %v771_v14, %v773_v19  ;;  %v778_v55 = vsel %vm768_vm9, %v775_v15, %v777_v49  ;;  %v857_v36 = vor.u32 %v856_v21, %v855_v2 }
 0x342   :  { %v782_v52 = vsel %vm768_vm9, %v779_v26, %v781_v20  ;;  %v2141_v29 = vmul.u32.u64.low %v2117_v56, %v778_v55  ;;  %v2142_v33 = vmul.u32.u64.high %v2117_v56, %v778_v55, %v2141_v29  ;;  %v860_v38 = vor.u32 %v859_v22, %v858_v44 }
 0x343   :  { %v2137_v24 = vmul.u32.u64.low %v2117_v56, %v782_v52  ;;  %v2138_v27 = vmul.u32.u64.high %v2117_v56, %v782_v52, %v2137_v24  ;;  %v864_v59 = vshll.u32 %v1883_v1, %v852_v47  ;;  %v865_v40 = vshrl.u32 %v1884_v3, %v853_v60 }
 0x344   :  { %v868_v41 = vshrl.u32 %v1885_v8, %v853_v60  ;;  %v790_v45 = vmul.u32 %v2117_v56, %v774_v32  ;;  %v854_v46 = vshrl.u32 %v1880_v57, %v853_v60  ;;  %v863_v51 = vor.u32 %v862_v39, %v861_v37 }
 0x345   :  { %v867_v54 = vshll.u32 %v1884_v3, %v852_v47  ;;  %vm792_vm13 = vc.u32 %v2138_v27, %v2141_v29  ;;  %v793_v61 = vadd.s32 1, %v2142_v33  ;;  %v866_v28 = vor.u32 %v865_v40, %v864_v59 }
 0x346   :  { %vm870_vm14 = vcmp.lt.s32.totalorder %v2119_v53, 1  ;;  %vm872_vm15 = vcmp.lt.s32.totalorder %v2119_v53, 3  ;;  %vm873_vm1 = vcmp.lt.s32.totalorder %v2119_v53, 4  ;;  %vm871_vm2 = vcmp.lt.s32.totalorder %v2119_v53, 2 }
 0x347   :  { %v869_v1 = vor.u32 %v868_v41, %v867_v54  ;;  %v878_v8 = vsel %vm870_vm14, %v857_v36, %v860_v38  ;;  %v794_v56 = vsel %vm792_vm13, %v793_v61, %v2142_v33  ;;  %v875_v58 = vsel %vm873_vm1, %v863_v51, 2102212464 }
 0x348   :  { %v879_v57 = vsel %vm873_vm1, %v866_v28, 920167782  ;;  %v882_v60 = vsel %vm870_vm14, %v860_v38, %v863_v51  ;;  %v795_v62 = vadd.s32 %v794_v56, %v790_v45  ;;  %v874_v63 = vsel %vm870_vm14, %v854_v46, %v857_v36 }
 0x349   :  { %v880_v3 = vsel %vm872_vm15, %v863_v51, %v879_v57  ;;  %v883_v47 = vsel %vm873_vm1, %v869_v1, 1326507024  ;;  %v876_v0 = vsel %vm872_vm15, %v860_v38, %v875_v58  ;;  %v791_v21 = vadd.s32 %v2141_v29, %v2138_v27 }
 0x34a   :  { %v881_v2 = vsel %vm871_vm2, %v878_v8, %v880_v3  ;;  %v884_v44 = vsel %vm872_vm15, %v866_v28, %v883_v47  ;;  %v796_v4 = vadd.s32 536870912, %v795_v62  ;;  %v877_v48 = vsel %vm871_vm2, %v874_v63, %v876_v0 }
 0x34b   :  { %v885_v34 = vsel %vm871_vm2, %v882_v60, %v884_v44  ;;  %v2159_v35 = vmul.u32.u64.low %v886_v43, %v881_v2  ;;  %v2160_v5 = vmul.u32.u64.high %v886_v43, %v881_v2, %v2159_v35  ;;  %v893_v53 = vmul.u32 %v886_v43, %v877_v48 }
 0x34c   :  { %v2162_v6 = vmul.u32.u64.low %v886_v43, %v885_v34  ;;  %v2163_v7 = vmul.u32.u64.high %v886_v43, %v885_v34, %v2162_v6  ;;  %v797_v42 = vshrl.u32 %v796_v4, 30  ;;  %v717_v27 = vmul.f32 0.70710677, %v2107_v25 }
 0x34d   :  { %v896_v9 = vadd.s32 1, %v2160_v5  ;;  %vm737_vm8 = vcmp.lt.s32.totalorder %v2107_v25, 0  ;;  %vm736_vm9 = vcmp.le.f32.partialorder %v735_v30, 0.7853982  ;;  %v718_v2 = vmul.f32 0.70710677, %v2105_v23 }
 0x34e   :  { %v798_v50 = vshll.u32 %v797_v42, 30  ;;  %vm895_vm3 = vc.u32 %v2163_v7, %v2159_v35  ;;  %v894_v45 = vadd.s32 %v2159_v35, %v2163_v7  ;;  %v821_v54 = vsub.s32 4, %v797_v42 }
 0x34f   :  { %v897_v11 = vsel %vm895_vm3, %v896_v9, %v2160_v5  ;;  %1828 = verf.f32 %v717_v27  ;;  %vm840_vm10 = vcmp.lt.s32.totalorder %v2105_v23, 0  ;;  %vm839_vm12 = vcmp.le.f32.partialorder %v838_v31, 0.7853982 }
 0x350   :  { %v799_v10 = vsub.s32 %v795_v62, %v798_v50  ;;  %v898_v12 = vadd.s32 %v897_v11, %v893_v53  ;;  %v822_v60 = vsel %vm737_vm8, %v821_v54, %v797_v42 }
 0x351   :  { %v824_v47 = vsel %vm736_vm9, 0, %v822_v60 }
 0x352   :  { %v801_v13 = vsub.s32 0, %v799_v10  ;;  %v899_v14 = vadd.s32 536870912, %v898_v12  ;;  %v1039_v34 = vadd.s32 3, %v824_v47  ;;  %v828_v7 = vand.u32 3, %v824_v47  ;;  %v1351_v47 = vld [vmem:[%s2341_s4 + $0x8] sm:$0xff] }
 0x354   :  { %v1597_v15 = vmin.u32 %v801_v13, %v799_v10  ;;  %v900_v16 = vshrl.u32 %v899_v14, 30  ;;  %v1040_v48 = vand.u32 3, %v1039_v34  ;;  %vm830_vm13 = vcmp.eq.s32.totalorder %v828_v7, 0 }
 0x355   :  { %vm833_vm14 = vcmp.eq.s32.totalorder %v828_v7, 2  ;;  %vm829_vm2 = vcmp.lt.s32.totalorder %v828_v7, 2  ;;  %v1370_v7 = vld [vmem:[%s2341_s4 + $0xa0] sm:$0xff] }
 0x356   :  { %v803_v17 = vclz %v1597_v15  ;;  %v901_v26 = vshll.u32 %v900_v16, 30  ;;  %v924_v4 = vsub.s32 4, %v900_v16  ;;  %vm1045_vm15 = vcmp.eq.s32.totalorder %v1040_v48, 2 }
 0x357   :  { %vm1042_vm1 = vcmp.eq.s32.totalorder %v1040_v48, 0  ;;  %vm1041_vm3 = vcmp.lt.s32.totalorder %v1040_v48, 2 }
 0x358   :  { %v1598_v18 = vadd.s32 4294967294, %v803_v17  ;;  %v902_v19 = vsub.s32 %v898_v12, %v901_v26  ;;  %v925_v5 = vsel %vm840_vm10, %v924_v4, %v900_v16  ;;  %v941_v12 = vstv %s2180_s2  ;;  %s1558_s2 = sshll.u32 %s1893_s0, 4  ;;  %s1559_s2 = int_to_ptr.vmem [resolvable:$true] %s1558_s2 }
 0x359   :  { %v1829_v6 = vpop.eup %1828  ;;  %v927_v9 = vsel %vm839_vm12, 0, %v925_v5  ;;  %v1353_v5 = vld [vmem:[%s2341_s4 + $0x18] sm:$0xff]  ;;  %p1857_p6 = scmp.lt.s32.totalorder %s1559_s2, %s1559_s2 }
 0x35a   :  { %vm1599_vm6 = vcmp.lt.s32.totalorder %v1598_v18, 0  ;;  %v904_v20 = vsub.s32 0, %v902_v19  ;;  %v721_v11 = vadd.f32 1.0, %v1829_v6  ;;  %v1143_v15 = vadd.s32 3, %v927_v9 }
 0x35b   :  { %v806_v49 = vsel %vm1599_vm6, 0, %v1598_v18  ;;  %vm827_vm6 = vweird.f32 %v2107_v25 }
 0x35c   :  { %v807_v32 = vsub.s32 32, %v806_v49  ;;  %v811_v55 = vsub.s32 4294967266, %v806_v49  ;;  %v1601_v52 = vmin.u32 %v904_v20, %v902_v19  ;;  %v808_v22 = vshll.u32 %v799_v10, %v806_v49 }
 0x35d   :  { %v715_v10 = vmul.f32 0.5, %v2107_v25 }
 0x35e   :  { %v809_v24 = vshrl.u32 %v791_v21, %v807_v32  ;;  %v812_v33 = vadd.s32 127, %v811_v55  ;;  %v906_v36 = vclz %v1601_v52  ;;  %v931_v55 = vand.u32 3, %v927_v9  ;;  %v1355_v9 = vld [vmem:[%s2341_s4 + $0x28] sm:$0xff] }
 0x35f   :  { %v723_v49 = vmul.f32 %v721_v11, %v715_v10  ;;  %v1373_v11 = vld [vmem:[%s2341_s4 + $0xb8] sm:$0xff] }
 0x360   :  { %v810_v38 = vor.u32 %v809_v24, %v808_v22  ;;  %v813_v37 = vshll.u32 %v812_v33, 23  ;;  %v1602_v39 = vadd.s32 4294967294, %v906_v36  ;;  %v1144_v22 = vand.u32 3, %v1143_v15 }
 0x361   :  { %v1167_v33 = vstv %s1166_s13  ;;  %s1852_s13 = scalar_lea.vmem %s1559_s2, 32 }
 0x362   :  { %v814_v59 = vor.u32 4788187, %v813_v37  ;;  %vm1603_vm7 = vcmp.lt.s32.totalorder %v1602_v39, 0  ;;  %v817_v41 = vcvt.s32.f32 %v810_v38  ;;  %p1853_p5 = scmp.ne.s32.totalorder %s1559_s2, %s1852_s13  ;;  %p1858_p7 = scmp.lt.s32.totalorder %s1852_s13, %s1852_s13 }
 0x363   :  { %v909_v43 = vsel %vm1603_vm7, 0, %v1602_v39  ;;  %vm936_vm7 = vcmp.eq.s32.totalorder %v931_v55, 2 }
 0x364   :  { %v815_v40 = vand.u32 2147483647, %v814_v59  ;;  %v910_v46 = vsub.s32 32, %v909_v43  ;;  %v914_v51 = vsub.s32 4294967266, %v909_v43  ;;  %v911_v61 = vshll.u32 %v902_v19, %v909_v43  ;;  %p1859_p8 = por %p1858_p7, %p1857_p6 }
 0x365   :  { %v1168_v59 = vmul.f32 %v1167_v33, %v723_v49 }
 0x366   :  { %v818_v29 = vmul.f32 %v817_v41, %v815_v40  ;;  %v912_v28 = vshrl.u32 %v894_v45, %v910_v46  ;;  %v915_v1 = vadd.s32 127, %v914_v51  ;;  %v716_v46 = vmul.f32 0.5, %v2105_v23  ;;  %p1860_p9 = pnand %p1859_p8, %p1853_p5 }
 0x368   :  { %v819_v8 = vxor.u32 2147483648, %v818_v29  ;;  %v913_v56 = vor.u32 %v912_v28, %v911_v61  ;;  %v916_v58 = vshll.u32 %v915_v1, 23 }
 0x36a   :  { %v820_v57 = vsel %vm737_vm8, %v819_v8, %v818_v29  ;;  %v917_v3 = vor.u32 4788187, %v916_v58  ;;  %v920_v0 = vcvt.s32.f32 %v913_v56  ;;  %vm1149_vm8 = vcmp.eq.s32.totalorder %v1144_v22, 2  ;;  %v1366_v56 = vld [vmem:[%s2341_s4 + $0x80] sm:$0xff] }
 0x36b   :  { %v823_v62 = vsel %vm736_vm9, %v2107_v25, %v820_v57  ;;  %vm933_vm9 = vcmp.eq.s32.totalorder %v931_v55, 0 }
 0x36c   :  { %1830 = vcosq.f32 %v823_v62  ;;  %v918_v63 = vand.u32 2147483647, %v917_v3  ;;  %v1350_v3 = vld [vmem:[%s2341_s4] sm:$0xff] }
 0x36d   :  { %1832 = vsinq.f32 %v823_v62 }
 0x36e   :  { %v921_v44 = vmul.f32 %v920_v0, %v918_v63  ;;  %1834 = verf.f32 %v718_v2  ;;  %v1368_v63 = vld [vmem:[%s2341_s4 + $0x90] sm:$0xff]  ;;  %v1731_v0 = vpack.c.bf16 %v1351_v47, %v1350_v3  ;;  %v1369_v2 = vld [vmem:[%s2341_s4 + $0x98] sm:$0xff] }
 0x370   :  { %v922_v35 = vxor.u32 2147483648, %v921_v44 }
 0x372   :  { %v923_v30 = vsel %vm840_vm10, %v922_v35, %v921_v44  ;;  %vm1146_vm10 = vcmp.eq.s32.totalorder %v1144_v22, 0  ;;  %v1733_v44 = vpack.c.bf16 %v1369_v2, %v1368_v63 }
 0x373   :  { %v926_v42 = vsel %vm839_vm12, %v2105_v23, %v923_v30  ;;  %vm932_vm12 = vcmp.lt.s32.totalorder %v931_v55, 2  ;;  %v1352_v30 = vld [vmem:[%s2341_s4 + $0x10] sm:$0xff]  ;;  %v1359_v55 = vld [vmem:[%s2341_s4 + $0x48] sm:$0xff] }
 0x374   :  { %1836 = vcosq.f32 %v926_v42  ;;  %v1735_v6 = vpack.c.bf16 %v1353_v5, %v1352_v30 }
 0x375   :  { %1838 = vsinq.f32 %v926_v42  ;;  %v1371_v42 = vld [vmem:[%s2341_s4 + $0xa8] sm:$0xff] }
 0x376   :  { %v1831_v50 = vpop.eup %1830  ;;  %v1737_v48 = vpack.c.bf16 %v1371_v42, %v1370_v7  ;;  %v1890_v7 = vmov 0.0|0.0   ;;  %v1468_v42 = vld [vmem:[%s2342_s5] sm:$0xff] }
 0x377   :  { %v1833_v53 = vpop.eup %1832  ;;  %v834_v31 = vxor.u32 2147483648, %v1831_v50  ;;  %1761 = vmatprep.subr.bf16.mxu1 %v1890_v7 }
 0x378   :  { %v831_v13 = vxor.u32 2147483648, %v1833_v53  ;;  %v1835_v32 = vpop.eup %1834 }
 0x379   :  { %v835_v14 = vsel %vm833_vm14, %v834_v31, %v1833_v53  ;;  %v1047_v16 = vsel %vm1045_vm15, %v834_v31, %v1833_v53  ;;  %v722_v37 = vadd.f32 1.0, %v1835_v32  ;;  %vm930_vm14 = vweird.f32 %v2105_v23  ;;  %v1367_v23 = vld [vmem:[%s2341_s4 + $0x88] sm:$0xff]  ;;  %v1372_v53 = vld [vmem:[%s2341_s4 + $0xb0] sm:$0xff]  ;;  %v1358_v32 = vld [vmem:[%s2341_s4 + $0x40] sm:$0xff] }
 0x37a   :  { %v832_v17 = vsel %vm830_vm13, %v1831_v50, %v831_v13  ;;  %v1044_v26 = vsel %vm1042_vm1, %v1831_v50, %v831_v13  ;;  %vm1145_vm13 = vcmp.lt.s32.totalorder %v1144_v22, 2  ;;  %v1729_v58 = vpack.c.bf16 %v1367_v23, %v1366_v56  ;;  %v1354_v50 = vld [vmem:[%s2341_s4 + $0x20] sm:$0xff]  ;;  %v1376_v22 = vld [vmem:[%s2341_s4 + $0xd0] sm:$0xff] }
 0x37b   :  { %v836_v18 = vsel %vm829_vm2, %v832_v17, %v835_v14  ;;  %v1048_v19 = vsel %vm1041_vm3, %v1044_v26, %v1047_v16  ;;  %v724_v61 = vmul.f32 %v722_v37, %v716_v46  ;;  %v1739_v10 = vpack.c.bf16 %v1355_v9, %v1354_v50  ;;  %v1356_v16 = vld [vmem:[%s2341_s4 + $0x30] sm:$0xff]  ;;  %v1357_v17 = vld [vmem:[%s2341_s4 + $0x38] sm:$0xff] }
 0x37c   :  { %v837_v20 = vsel %vm827_vm6, nan, %v836_v18  ;;  %v1049_v21 = vsel %vm827_vm6, nan, %v1048_v19  ;;  %1730 = vmatprep.subr.bf16.mxu0 %v1729_v58  ;;  %v1741_v31 = vpack.c.bf16 %v1373_v11, %v1372_v53  ;;  %v1743_v26 = vpack.c.bf16 %v1357_v17, %v1356_v16  ;;  %v1374_v18 = vld [vmem:[%s2341_s4 + $0xc0] sm:$0xff]  ;;  %v1375_v19 = vld [vmem:[%s2341_s4 + $0xc8] sm:$0xff]  ;;  %v1360_v37 = vld [vmem:[%s2341_s4 + $0x50] sm:$0xff] }
 0x37d   :  { %v942_v52 = vmul.f32 %v941_v12, %v837_v20  ;;  %v1154_v24 = vmul.f32 %v1049_v21, %v941_v12  ;;  %v1169_v8 = vmul.f32 %v1167_v33, %v724_v61  ;;  %1732 = vmatpush3.bf16.msra.mxu0 %v1731_v0  ;;  %v1745_v20 = vpack.c.bf16 %v1375_v19, %v1374_v18  ;;  %v1380_v46 = vld [vmem:[%s2341_s4 + $0xf0] sm:$0xff]  ;;  %v1471_v53 = vld [vmem:[%s2342_s5 + $0x18] sm:$0xff]  ;;  %v1626_v17 = vld [vmem:[%s2342_s5 + $0x20] ss:$0 sm:$0xff] }
 0x37e   :  { %v1837_v36 = vpop.eup %1836  ;;  %1734 = vmatprep.subr.bf16.mxu0 %v1733_v44  ;;  %vm1223_vm15 = vcmask 1041152   ;;  %v1470_v9 = vld [vmem:[%s2342_s5 + $0x10] sm:$0xff]  ;;  %vm1891_vm1 = vmmov 0   ;;  %v1892_v11 = vmov 0.0   ;;  %vm1550_vm2 = vcmask 25600  }
 0x37f   :  { %944 = vst.msk [vmem:[#allocation2] sm:$0xff] %vm383_vm11, %v942_v52  ;;  %1158 = vrot.lane.b32.xlu0 %v1154_v24, %s1886_s24  ;;  %v1839_v38 = vpop.eup %1838  ;;  %v937_v39 = vxor.u32 2147483648, %v1837_v36  ;;  %v1747_v52 = vpack.c.bf16 %v1359_v55, %v1358_v32  ;;  %v1377_v24 = vld [vmem:[%s2341_s4 + $0xd8] sm:$0xff]  ;;  %1710 = vmatprep.mubr.msk.f32.mxu1 %vm1891_vm1, %v1892_v11 }
 0x380   :  { %v934_v25 = vxor.u32 2147483648, %v1839_v38 }
 0x381   :  { %v938_v40 = vsel %vm936_vm7, %v937_v39, %v1839_v38  ;;  %v1151_v41 = vsel %vm1149_vm8, %v937_v39, %v1839_v38  ;;  %1736 = vmatpush3.bf16.msra.mxu0 %v1735_v6  ;;  %v1361_v39 = vld [vmem:[%s2341_s4 + $0x58] sm:$0xff] }
 0x382   :  { %v935_v43 = vsel %vm933_vm9, %v1837_v36, %v934_v25  ;;  %v1148_v45 = vsel %vm1146_vm10, %v1837_v36, %v934_v25  ;;  %1738 = vmatprep.subr.bf16.mxu0 %v1737_v48  ;;  %v1749_v36 = vpack.c.bf16 %v1377_v24, %v1376_v22  ;;  %v1378_v25 = vld [vmem:[%s2341_s4 + $0xe0] sm:$0xff]  ;;  %v1469_v48 = vld [vmem:[%s2342_s5 + $0x8] sm:$0xff] }
 0x383   :  { %1172 = vrot.lane.b32.xlu0 %v1168_v59, %s1886_s24  ;;  %v939_v51 = vsel %vm932_vm12, %v935_v43, %v938_v40  ;;  %v1152_v27 = vsel %vm1145_vm13, %v1148_v45, %v1151_v41  ;;  %v1751_v59 = vpack.c.bf16 %v1361_v39, %v1360_v37  ;;  %v1379_v40 = vld [vmem:[%s2341_s4 + $0xe8] sm:$0xff]  ;;  %v1362_v41 = vld [vmem:[%s2341_s4 + $0x60] sm:$0xff]  ;;  %v1762_v50 = vpack.c.bf16 %v1469_v48, %v1468_v42 }
 0x384   :  { %v940_v29 = vsel %vm930_vm14, nan, %v939_v51  ;;  %v1153_v54 = vsel %vm930_vm14, nan, %v1152_v27  ;;  %v1363_v43 = vld [vmem:[%s2341_s4 + $0x68] sm:$0xff]  ;;  %v1753_v45 = vpack.c.bf16 %v1379_v40, %v1378_v25  ;;  %v1381_v51 = vld [vmem:[%s2341_s4 + $0xf8] sm:$0xff] }
 0x385   :  { %v943_v28 = vmul.f32 %v941_v12, %v940_v29  ;;  %v1155_v1 = vmul.f32 %v1153_v54, %v941_v12  ;;  %1740 = vmatpush3.bf16.msra.mxu0 %v1739_v10  ;;  %v1755_v54 = vpack.c.bf16 %v1363_v43, %v1362_v41  ;;  %v1757_v61 = vpack.c.bf16 %v1381_v51, %v1380_v46 }
 0x386   :  { %1742 = vmatprep.subr.bf16.mxu0 %v1741_v31  ;;  %1763 = vmatpush3.bf16.msra.mxu1 %v1762_v50  ;;  %v1765_v10 = vpack.c.bf16 %v1471_v53, %v1470_v9 }
 0x387   :  { %945 = vst.msk [vmem:[#allocation2 + $0x8] sm:$0xff] %vm383_vm11, %v943_v28  ;;  %1160 = vrot.lane.b32.xlu1 %v1155_v1, %s1886_s24  ;;  %vm1181_vm11 = vcmask 253952   ;;  %v1364_v28 = vld [vmem:[%s2341_s4 + $0x70] sm:$0xff]  ;;  %v1365_v1 = vld [vmem:[%s2341_s4 + $0x78] sm:$0xff]  ;;  %1764 = vmatprep.subr.bf16.mxu1 %v1890_v7 }
 0x388   :  { %v1759_v23 = vpack.c.bf16 %v1365_v1, %v1364_v28 }
 0x389   :  { %1744 = vmatpush3.bf16.msra.mxu0 %v1743_v26 }
 0x38a   :  { %1746 = vmatprep.subr.bf16.mxu0 %v1745_v20  ;;  %1766 = vmatpush3.bf16.msra.mxu1 %v1765_v10 }
 0x38b   :  { %1174 = vrot.lane.b32.xlu1 %v1169_v8, %s1886_s24  ;;  %s1888_s24 = smov 64  }
 0x38d   :  { %1748 = vmatpush3.bf16.msra.mxu0 %v1747_v52 }
 0x38e   :  { %1750 = vmatprep.subr.bf16.mxu0 %v1749_v36 }
 0x391   :  { %1752 = vmatpush3.bf16.msra.mxu0 %v1751_v59 }
 0x392   :  { %1754 = vmatprep.subr.bf16.mxu0 %v1753_v45 }
 0x395   :  { %1756 = vmatpush3.bf16.msra.mxu0 %v1755_v54 }
 0x396   :  { %1758 = vmatprep.subr.bf16.mxu0 %v1757_v61 }
 0x399   :  { %1760 = vmatpush3.bf16.msra.mxu0 %v1759_v23 }
 0x3f1   :  { %v1159_v57 = vpop.permute.xlu0 %1158 }
 0x3f2   :  { %1164 = vst.msk [vmem:[#allocation2] sm:$0xff] %vm604_vm4, %v1159_v57 }
 0x3f5   :  { %v1173_v60 = vpop.permute.xlu0 %1172 }
 0x3f6   :  { %1178 = vst.msk [vmem:[#allocation2] sm:$0xff] %vm619_vm5, %v1173_v60 }
 0x3f9   :  { %v1161_v62 = vpop.permute.xlu1 %1160 }
 0x3fa   :  { %1165 = vst.msk [vmem:[#allocation2 + $0x8] sm:$0xff] %vm604_vm4, %v1161_v62  ;;  %vm1195_vm4 = vcmask 516352  }
 0x3fd   :  { %v1225_v4 = vld [vmem:[#allocation2 + $0x4] sm:$0x1]  ;;  %v1175_v34 = vpop.permute.xlu1 %1174  ;;  %v1180_v35 = vld [vmem:[#allocation2] sm:$0x1] }
 0x3fe   :  { %1226 = vst.msk [vmem:[#allocation3 + $0x2] sm:$0x1] %vm1181_vm11, %v1225_v4  ;;  %1182 = vst.msk [vmem:[#allocation3] sm:$0x1] %vm1181_vm11, %v1180_v35 }
 0x3ff   :  { %1179 = vst.msk [vmem:[#allocation2 + $0x8] sm:$0xff] %vm619_vm5, %v1175_v34  ;;  %v1615_v33 = vld.sshfl [vmem:[#allocation2 + $0x5] sm:$0x1 pattern:$0x76325410]  ;;  %vm1209_vm5 = vcmask 778752  }
 0x400   :  { %v1612_v38 = vld.sshfl [vmem:[#allocation2 + $0x1] sm:$0x1 pattern:$0x76325410] }
 0x401   :  { %v1616_v27 = vld.sshfl [vmem:[#allocation2 + $0x6] sm:$0x1 pattern:$0x76325410] }
 0x402   :  { %v1613_v29 = vld.sshfl [vmem:[#allocation2 + $0x2] sm:$0x1 pattern:$0x76325410] }
 0x403   :  { %v1617_v8 = vld.sshfl [vmem:[#allocation2 + $0x7] sm:$0x1 pattern:$0x76325410] }
 0x404   :  { %v1614_v56 = vld.sshfl [vmem:[#allocation2 + $0x3] sm:$0x1 pattern:$0x76325410] }
 0x406   :  { %v1621_v12 = vld.sshfl [vmem:[#allocation2 + $0xd] sm:$0x1 pattern:$0x76325410]  ;;  %v1307_v13 = vld [vmem:[#allocation2 + $0xc] sm:$0x1] }
 0x407   :  { %1318 = vrot.lane.b32.xlu1 %v1621_v12, %s1887_s15  ;;  %v1618_v14 = vld.sshfl [vmem:[#allocation2 + $0x9] sm:$0x1 pattern:$0x76325410]  ;;  %1308 = vst.msk [vmem:[#allocation3 + $0x3] sm:$0x1] %vm1181_vm11, %v1307_v13 }
 0x408   :  { %v1266_v15 = vld [vmem:[#allocation2 + $0x8] sm:$0x1]  ;;  %1277 = vrot.lane.b32.xlu0 %v1618_v14, %s1887_s15  ;;  %v1622_v49 = vld.sshfl [vmem:[#allocation2 + $0xe] sm:$0x1 pattern:$0x76325410] }
 0x409   :  { %1267 = vst.msk [vmem:[#allocation3 + $0x1] sm:$0x1] %vm1181_vm11, %v1266_v15  ;;  %v1619_v21 = vld.sshfl [vmem:[#allocation2 + $0xa] sm:$0x1 pattern:$0x76325410] }
 0x40a   :  { %v1623_v58 = vld.sshfl [vmem:[#allocation2 + $0xf] sm:$0x1 pattern:$0x76325410]  ;;  %v1624_v12 = vld [vmem:[%s2338_s1 + $0x9] ss:$0 sm:$0xff] }
 0x40b   :  { %1331 = vrot.lane.b32.xlu1 %v1622_v49, %s1888_s24  ;;  %v1620_v57 = vld.sshfl [vmem:[#allocation2 + $0xb] sm:$0x1 pattern:$0x76325410] }
 0x40c   :  { %1290 = vrot.lane.b32.xlu0 %v1619_v21, %s1888_s24 }
 0x40f   :  { %1236 = vrot.lane.b32.xlu1 %v1615_v33, %s1887_s15 }
 0x410   :  { %1192 = vrot.lane.b32.xlu0 %v1612_v38, %s1887_s15 }
 0x413   :  { %1249 = vrot.lane.b32.xlu1 %v1616_v27, %s1888_s24 }
 0x414   :  { %1206 = vrot.lane.b32.xlu0 %v1613_v29, %s1888_s24 }
 0x417   :  { %1262 = vrot.lane.b32.xlu1 %v1617_v8, %s1889_s27 }
 0x418   :  { %1220 = vrot.lane.b32.xlu0 %v1614_v56, %s1889_s27 }
 0x41b   :  { %1344 = vrot.lane.b32.xlu1 %v1623_v58, %s1889_s27 }
 0x41c   :  { %1303 = vrot.lane.b32.xlu0 %v1620_v57, %s1889_s27 }
 0x479   :  { %v1319_v60 = vpop.permute.xlu1 %1318 }
 0x47a   :  { %1321 = vst.msk [vmem:[#allocation3 + $0x3] sm:$0x1] %vm1195_vm4, %v1319_v60  ;;  %v1278_v62 = vpop.permute.xlu0 %1277 }
 0x47b   :  { %1280 = vst.msk [vmem:[#allocation3 + $0x1] sm:$0x1] %vm1195_vm4, %v1278_v62 }
 0x47d   :  { %v1332_v3 = vpop.permute.xlu1 %1331 }
 0x47e   :  { %1334 = vst.msk [vmem:[#allocation3 + $0x3] sm:$0x1] %vm1209_vm5, %v1332_v3  ;;  %v1291_v47 = vpop.permute.xlu0 %1290 }
 0x47f   :  { %1293 = vst.msk [vmem:[#allocation3 + $0x1] sm:$0x1] %vm1209_vm5, %v1291_v47 }
 0x481   :  { %v1237_v63 = vpop.permute.xlu1 %1236 }
 0x482   :  { %1239 = vst.msk [vmem:[#allocation3 + $0x2] sm:$0x1] %vm1195_vm4, %v1237_v63  ;;  %v1193_v0 = vpop.permute.xlu0 %1192 }
 0x483   :  { %1196 = vst.msk [vmem:[#allocation3] sm:$0x1] %vm1195_vm4, %v1193_v0 }
 0x485   :  { %v1250_v2 = vpop.permute.xlu1 %1249 }
 0x486   :  { %1252 = vst.msk [vmem:[#allocation3 + $0x2] sm:$0x1] %vm1209_vm5, %v1250_v2  ;;  %v1207_v44 = vpop.permute.xlu0 %1206 }
 0x487   :  { %1210 = vst.msk [vmem:[#allocation3] sm:$0x1] %vm1209_vm5, %v1207_v44 }
 0x489   :  { %v1263_v4 = vpop.permute.xlu1 %1262 }
 0x48a   :  { %1265 = vst.msk [vmem:[#allocation3 + $0x2] sm:$0x1] %vm1223_vm15, %v1263_v4  ;;  %v1221_v34 = vpop.permute.xlu0 %1220 }
 0x48b   :  { %1224 = vst.msk [vmem:[#allocation3] sm:$0x1] %vm1223_vm15, %v1221_v34 }
 0x48d   :  { %v1345_v35 = vpop.permute.xlu1 %1344 }
 0x48e   :  { %1347 = vst.msk [vmem:[#allocation3 + $0x3] sm:$0x1] %vm1223_vm15, %v1345_v35  ;;  %v1304_v30 = vpop.permute.xlu0 %1303 }
 0x48f   :  { %1306 = vst.msk [vmem:[#allocation3 + $0x1] sm:$0x1] %vm1223_vm15, %v1304_v30 }
 0x496   :  { %v1625_v5 = vld.sshfl [vmem:[#allocation3] sm:$0x33 pattern:$0x76325410] }
 0x497   :  { %v1394_v6 = vcombine.high %v1625_v5, %v1625_v5 }
 0x499   :  { %1461 = vmatprep.mubr.f32.mxu0 %v1394_v6 }
 0x49a   :  { %1462 = vmatmul.mubr.f32.vlgmr.msra.gmra.mrb[0].mxu0 %v1625_v5 }
 0x56d   :  { %v1672_v31 = vpop.f32.mrb[0].mxu0 }
 0x56e   :  { %v1673_v13 = vpop.f32.mrb[1].mxu0 }
 0x56f   :  { %v1674_v14 = vadd.f32 %v1673_v13, %v1672_v31 }
 0x571   :  { %v1464_v15 = vadd.f32 %v1674_v14, %v1624_v12 }
 0x573   :  { %v1467_v16 = vmax.f32 %v1464_v15, 0.0 }
 0x575   :  { %1711 = vmatmul.mubr.msk.f32.vlgmr.msra.gmra.mrb[4].mxu1 %vm51_vm0, %v1467_v16 }
 0x648   :  { %v1546_v26 = vpop.f32.mrb[4].mxu1 }
 0x649   :  { %v1547_v18 = vadd.f32 %v1626_v17, %v1546_v26  ;;  %v1712_v19 = vpop.f32.mrb[5].mxu1 }
 0x64b   :  { %1551 = vst.msk [vmem:[#allocation7] sm:$0x3] %vm1550_vm2, %v1547_v18 }
 0x64c   :  { %1863 = shalt.err (!%p1860_p9)
}
 0x64d   :  { %s1864_s16 = scalar_lea.hbm %s2343_s6, 32 }
 0x64e   :  { %p1865_p10 = scmp.ne.s32.totalorder %s2343_s6, %s1864_s16  ;;  %p1868_p11 = scmp.lt.u32.totalorder %s1864_s16, %s2343_s6 }
 0x650   :  { %p1870_p12 = pnand %p1868_p11, %p1865_p10 }
 0x652   :  { %1873 = shalt.err (!%p1870_p12)
}
 0x653   :  { %1561 = dma.vmem_to_hbm [thread:$0]  %s1559_s2, 32, %s2343_s6, [#allocation5]  }
 0x654   :  { %1876 = dma.done.wait [#allocation5], 32  }
 0x655   :  { %1877 = vsyncadd [#allocation5], 4294967264 }
 0x656   :  { %1565 = vsyncpa [#allocation5], 1 }
 0x657   :  { %1566 = vsyncpa [#allocation6], 1 }

</bundles_post_ra>
